<compile_context>
chip_gen: v7x
topology: tpu7x:2x2x1
jax: 0.10.0
libtpu: 0.0.40
codegen_flags: <defaults>
</compile_context>

<pallas_src>
import jax
import jax.numpy as jnp
from jax.experimental import pallas as pl
from jax.experimental.pallas import tpu as pltpu

LANE = 128      # vreg lane width: hidden dim padded to this (zero padding, math unchanged)
SUBLANE = 8     # f32 sublane width: batch tiles are a multiple of this


def _round_up(x, m):
    return ((x + m - 1) // m) * m


def mlp_kernel(x_ref, w1_ref, b1_ref, w2_ref, b2_ref, w3_ref, b3_ref, out_ref):
    # One (TB, input_size) batch tile per grid step.  Weights/biases are VMEM-resident
    # (constant index_map); x / out tiles are pipelined by Pallas.  Three bf16 MXU
    # matmuls with f32 accumulation; bias-add + ReLU are f32 VPU filler under DMA/MXU.
    x = x_ref[...].astype(jnp.bfloat16)                               # cast in-kernel (no wrapper pass)

    h1 = jnp.dot(x, w1_ref[...], preferred_element_type=jnp.float32) + b1_ref[...]
    h1 = jnp.maximum(h1, 0.0)

    h2 = jnp.dot(h1.astype(jnp.bfloat16), w2_ref[...],
                 preferred_element_type=jnp.float32) + b2_ref[...]
    h2 = jnp.maximum(h2, 0.0)

    y = jnp.dot(h2.astype(jnp.bfloat16), w3_ref[...],
                preferred_element_type=jnp.float32) + b3_ref[...]
    out_ref[...] = y.astype(out_ref.dtype)


def init_params(key, input_size, hidden_size, output_size):
    """nn.Linear-style init (uniform(-1/sqrt(fan_in), +)).  Hidden dims are zero-padded
    to the 128-lane width (so intermediate MXU tiles are dense) but the input K dim and
    the output N dim stay at their logical sizes -> no wrapper padding of x and a
    logical-width output stream.  Weights bf16, biases f32."""
    ks = jax.random.split(key, 6)
    Fh = _round_up(hidden_size, LANE)

    def linear(kw, kb, fan_in, fan_out, pad_in, pad_out):
        bound = 1.0 / (float(fan_in) ** 0.5)
        w = jax.random.uniform(kw, (fan_in, fan_out), jnp.float32, -bound, bound)
        b = jax.random.uniform(kb, (1, fan_out), jnp.float32, -bound, bound)
        w = jnp.pad(w, ((0, pad_in - fan_in), (0, pad_out - fan_out))).astype(jnp.bfloat16)
        b = jnp.pad(b, ((0, 0), (0, pad_out - fan_out)))              # stays f32
        return w, b

    w1, b1 = linear(ks[0], ks[1], input_size, hidden_size, input_size, Fh)
    w2, b2 = linear(ks[2], ks[3], hidden_size, hidden_size, Fh, Fh)
    w3, b3 = linear(ks[4], ks[5], hidden_size, output_size, Fh, output_size)
    params = {"w1": w1, "b1": b1, "w2": w2, "b2": b2, "w3": w3, "b3": b3}
    dims = (input_size, hidden_size, output_size)
    return params, dims


def mlp_forward(x, params, dims, *, block_b=1024):
    """x: [B, input_size] f32 (or bf16).  Returns [B, output_size] f32."""
    input_size, hidden_size, output_size = dims
    w1, b1 = params["w1"], params["b1"]
    w2, b2 = params["w2"], params["b2"]
    w3, b3 = params["w3"], params["b3"]
    Fin = w1.shape[0]          # logical input width (unpadded K of layer 1)
    Fout = w3.shape[1]         # logical output width (unpadded N of layer 3)
    assert x.shape[1] == Fin

    B = x.shape[0]
    # Generation-aware batch tile: large tiles amortize the ~0.35us/step grid overhead and
    # keep the mem-bound kernel near the HBM roofline, but cap at ~half the batch so the
    # "parallel" batch axis has >=2 balanced steps for v7x's two TensorCores.
    half_b = _round_up(pl.cdiv(B, 2), SUBLANE)
    TB = max(SUBLANE, min(_round_up(block_b, SUBLANE), half_b))
    grid = (pl.cdiv(B, TB),)
    # No wrapper batch/feature pad and no wrapper dtype cast: the ragged last batch block
    # is masked by Pallas, and the bf16 cast happens inside the kernel, so the activation
    # is read from HBM exactly once.

    try:
        vmem_cap = int(pltpu.get_tpu_info().vmem_capacity_bytes)
    except Exception:
        vmem_cap = 64 << 20    # conservative default: v7x per-TensorCore VMEM

    resident_bytes = sum(int(a.size) * a.dtype.itemsize for a in (w1, b1, w2, b2, w3, b3))
    if 2 * resident_bytes > int(0.4 * vmem_cap):
        # TODO(synk): switch to a K/N-tiled weight grid with an f32 VMEM accumulator once
        # the parameters no longer fit VMEM-resident (hidden >~ 3-4k bf16 on v7x's 64 MiB).
        raise NotImplementedError(
            "weights too large for the VMEM-resident layout on this chip")

    def call(single_buffer_params):
        def resident(a):
            # Parameters: full-array block, constant index_map -> DMA'd once, VMEM-resident.
            # Single-buffered so they don't pay the default 2x pipeline-buffer VMEM cost.
            if single_buffer_params:
                return pl.BlockSpec(a.shape, lambda i: (0, 0),
                                    pipeline_mode=pl.Buffered(1))
            return pl.BlockSpec(a.shape, lambda i: (0, 0))

        n_param_bufs = 1 if single_buffer_params else 2
        io_bytes = 2 * TB * (Fin * x.dtype.itemsize + Fout * 4)   # double-buffered x / out tiles
        need = int(1.5 * (n_param_bufs * resident_bytes + io_bytes)) + (4 << 20)
        vmem_limit = max(8 << 20, min(need, int(0.6 * vmem_cap)))  # capacity-relative cap (v7x-safe)

        return pl.pallas_call(
            mlp_kernel,
            out_shape=jax.ShapeDtypeStruct((B, Fout), jnp.float32),
            grid=grid,
            in_specs=[
                pl.BlockSpec((TB, Fin), lambda i: (i, 0)),        # streamed batch tile
                resident(w1), resident(b1),
                resident(w2), resident(b2),
                resident(w3), resident(b3),
            ],
            # Logical-width f32 output: 16x fewer HBM write bytes than a 128-lane-padded
            # slab and no post-kernel column slice; masked stores are negligible here.
            out_specs=pl.BlockSpec((TB, Fout), lambda i: (i, 0)),
            compiler_params=pltpu.CompilerParams(
                dimension_semantics=("parallel",),                # megacore sharding on v7x
                vmem_limit_bytes=vmem_limit,
            ),
        )(x, w1, b1, w2, b2, w3, b3)

    try:
        return call(True)
    except Exception:
        # pl.Buffered(1) not accepted by this JAX/Mosaic version -> default double buffering.
        return call(False)


def mlp_reference(x, params, dims):
    """Pure-JAX reference on the logical (unpadded) shapes, same bf16-input /
    f32-accumulation numerics as the kernel."""
    input_size, hidden_size, output_size = dims
    w1 = params["w1"][:, :hidden_size]
    b1 = params["b1"][:, :hidden_size]
    w2 = params["w2"][:hidden_size, :hidden_size]
    b2 = params["b2"][:, :hidden_size]
    w3 = params["w3"][:hidden_size, :]
    b3 = params["b3"]

    h1 = jnp.maximum(
        jnp.dot(x.astype(jnp.bfloat16), w1, preferred_element_type=jnp.float32) + b1, 0.0)
    h2 = jnp.maximum(
        jnp.dot(h1.astype(jnp.bfloat16), w2, preferred_element_type=jnp.float32) + b2, 0.0)
    return jnp.dot(h2.astype(jnp.bfloat16), w3, preferred_element_type=jnp.float32) + b3


if __name__ == "__main__":
    key = jax.random.PRNGKey(0)
    k_in, k_params = jax.random.split(key)

    # Module-consistent small feature sizes; batch large enough (and a non-multiple of the
    # tile) to exercise the >=2-step pipelined grid, the ragged last block, and masking.
    batch, input_size, hidden_size, output_size = 500, 16, 32, 8

    x = jax.random.normal(k_in, (batch, input_size), jnp.float32)
    params, dims = init_params(k_params, input_size, hidden_size, output_size)

    out = mlp_forward(x, params, dims)
    out = jax.block_until_ready(out)

    ref = mlp_reference(x, params, dims)
    assert out.shape == (batch, output_size)
    max_err = float(jnp.max(jnp.abs(out - ref)))
    # Tolerance covers occasional one-ULP bf16 rounding flips of intermediates caused by
    # different f32 accumulation order (MXU vs XLA); real bugs would be orders larger.
    assert jnp.allclose(out, ref, atol=2e-3, rtol=2e-3), f"mismatch vs reference (max abs err {max_err})"

    print("KERNEL_OK")
</pallas_src>

<mosaic_0001>
module attributes {stable_mosaic.version = 11 : i64} {
  func.func @mlp_kernel(%arg0: i32, %arg1: memref<256x16xf32, #tpu.memory_space<vmem>>, %arg2: memref<16x128xbf16, #tpu.memory_space<vmem>>, %arg3: memref<1x128xf32, #tpu.memory_space<vmem>>, %arg4: memref<128x128xbf16, #tpu.memory_space<vmem>>, %arg5: memref<1x128xf32, #tpu.memory_space<vmem>>, %arg6: memref<128x8xbf16, #tpu.memory_space<vmem>>, %arg7: memref<1x8xf32, #tpu.memory_space<vmem>>, %arg8: memref<256x8xf32, #tpu.memory_space<vmem>>) attributes {dimension_semantics = [#tpu.dimension_semantics<parallel>], iteration_bounds = array<i64: 2>, scalar_prefetch = 0 : i64, scratch_operands = 0 : i64, tpu.core_type = #tpu.core_type<tc>, window_params = [{transform_indices = @transform_0, window_bounds = array<i64: 256, 16>}, {pipeline_mode = #tpu.pipeline_mode<synchronous>, transform_indices = @transform_1, window_bounds = array<i64: 16, 128>}, {pipeline_mode = #tpu.pipeline_mode<synchronous>, transform_indices = @transform_2, window_bounds = array<i64: 1, 128>}, {pipeline_mode = #tpu.pipeline_mode<synchronous>, transform_indices = @transform_3, window_bounds = array<i64: 128, 128>}, {pipeline_mode = #tpu.pipeline_mode<synchronous>, transform_indices = @transform_4, window_bounds = array<i64: 1, 128>}, {pipeline_mode = #tpu.pipeline_mode<synchronous>, transform_indices = @transform_5, window_bounds = array<i64: 128, 8>}, {pipeline_mode = #tpu.pipeline_mode<synchronous>, transform_indices = @transform_6, window_bounds = array<i64: 1, 8>}, {transform_indices = @transform_7, window_bounds = array<i64: 256, 8>}]} {
    %c0 = arith.constant 0 : index
    %c0_0 = arith.constant 0 : index
    %0 = vector.load %arg1[%c0, %c0_0] : memref<256x16xf32, #tpu.memory_space<vmem>>, vector<256x16xf32>
    %1 = arith.truncf %0 : vector<256x16xf32> to vector<256x16xbf16>
    %c0_1 = arith.constant 0 : index
    %c0_2 = arith.constant 0 : index
    %2 = vector.load %arg2[%c0_1, %c0_2] : memref<16x128xbf16, #tpu.memory_space<vmem>>, vector<16x128xbf16>
    %cst = arith.constant dense<0.000000e+00> : vector<256x128xf32>
    %3 = tpu.matmul %1, %2, %cst {dimension_numbers = #tpu.dot_dimension_numbers<[1], [0], [0], [1], [0, 0, 1, 1], [], []>} : vector<256x16xbf16>, vector<16x128xbf16>, vector<256x128xf32> -> vector<256x128xf32>
    %c0_3 = arith.constant 0 : index
    %c0_4 = arith.constant 0 : index
    %4 = vector.load %arg3[%c0_3, %c0_4] : memref<1x128xf32, #tpu.memory_space<vmem>>, vector<1x128xf32>
    %5 = vector.broadcast %4 : vector<1x128xf32> to vector<256x128xf32>
    %6 = arith.addf %3, %5 : vector<256x128xf32>
    %cst_5 = arith.constant 0.000000e+00 : f32
    %7 = vector.broadcast %cst_5 : f32 to vector<256x128xf32>
    %8 = arith.maximumf %6, %7 : vector<256x128xf32>
    %9 = arith.truncf %8 : vector<256x128xf32> to vector<256x128xbf16>
    %c0_6 = arith.constant 0 : index
    %c0_7 = arith.constant 0 : index
    %10 = vector.load %arg4[%c0_6, %c0_7] : memref<128x128xbf16, #tpu.memory_space<vmem>>, vector<128x128xbf16>
    %cst_8 = arith.constant dense<0.000000e+00> : vector<256x128xf32>
    %11 = tpu.matmul %9, %10, %cst_8 {dimension_numbers = #tpu.dot_dimension_numbers<[1], [0], [0], [1], [0, 0, 1, 1], [], []>} : vector<256x128xbf16>, vector<128x128xbf16>, vector<256x128xf32> -> vector<256x128xf32>
    %c0_9 = arith.constant 0 : index
    %c0_10 = arith.constant 0 : index
    %12 = vector.load %arg5[%c0_9, %c0_10] : memref<1x128xf32, #tpu.memory_space<vmem>>, vector<1x128xf32>
    %13 = vector.broadcast %12 : vector<1x128xf32> to vector<256x128xf32>
    %14 = arith.addf %11, %13 : vector<256x128xf32>
    %cst_11 = arith.constant 0.000000e+00 : f32
    %15 = vector.broadcast %cst_11 : f32 to vector<256x128xf32>
    %16 = arith.maximumf %14, %15 : vector<256x128xf32>
    %17 = arith.truncf %16 : vector<256x128xf32> to vector<256x128xbf16>
    %c0_12 = arith.constant 0 : index
    %c0_13 = arith.constant 0 : index
    %18 = vector.load %arg6[%c0_12, %c0_13] : memref<128x8xbf16, #tpu.memory_space<vmem>>, vector<128x8xbf16>
    %cst_14 = arith.constant dense<0.000000e+00> : vector<256x8xf32>
    %19 = tpu.matmul %17, %18, %cst_14 {dimension_numbers = #tpu.dot_dimension_numbers<[1], [0], [0], [1], [0, 0, 1, 1], [], []>} : vector<256x128xbf16>, vector<128x8xbf16>, vector<256x8xf32> -> vector<256x8xf32>
    %c0_15 = arith.constant 0 : index
    %c0_16 = arith.constant 0 : index
    %20 = vector.load %arg7[%c0_15, %c0_16] : memref<1x8xf32, #tpu.memory_space<vmem>>, vector<1x8xf32>
    %21 = vector.broadcast %20 : vector<1x8xf32> to vector<256x8xf32>
    %22 = arith.addf %19, %21 : vector<256x8xf32>
    %c0_17 = arith.constant 0 : index
    %c0_18 = arith.constant 0 : index
    %23 = vector.load %arg8[%c0_17, %c0_18] : memref<256x8xf32, #tpu.memory_space<vmem>>, vector<256x8xf32>
    tpu.vector_store %arg8[%c0_17, %c0_18], %22 {strides = array<i32>} : memref<256x8xf32, #tpu.memory_space<vmem>>, vector<256x8xf32>,
    return
  }
  func.func @transform_0(%arg0: i32) -> (i32, i32) {
    %c0_i32 = arith.constant 0 : i32
    %c0_i32_0 = arith.constant 0 : i32
    return %arg0, %c0_i32 : i32, i32
  }
  func.func @transform_1(%arg0: i32) -> (i32, i32) {
    %c0_i32 = arith.constant 0 : i32
    %c0_i32_0 = arith.constant 0 : i32
    %c0_i32_1 = arith.constant 0 : i32
    return %c0_i32, %c0_i32_0 : i32, i32
  }
  func.func @transform_2(%arg0: i32) -> (i32, i32) {
    %c0_i32 = arith.constant 0 : i32
    %c0_i32_0 = arith.constant 0 : i32
    %c0_i32_1 = arith.constant 0 : i32
    return %c0_i32, %c0_i32_0 : i32, i32
  }
  func.func @transform_3(%arg0: i32) -> (i32, i32) {
    %c0_i32 = arith.constant 0 : i32
    %c0_i32_0 = arith.constant 0 : i32
    %c0_i32_1 = arith.constant 0 : i32
    return %c0_i32, %c0_i32_0 : i32, i32
  }
  func.func @transform_4(%arg0: i32) -> (i32, i32) {
    %c0_i32 = arith.constant 0 : i32
    %c0_i32_0 = arith.constant 0 : i32
    %c0_i32_1 = arith.constant 0 : i32
    return %c0_i32, %c0_i32_0 : i32, i32
  }
  func.func @transform_5(%arg0: i32) -> (i32, i32) {
    %c0_i32 = arith.constant 0 : i32
    %c0_i32_0 = arith.constant 0 : i32
    %c0_i32_1 = arith.constant 0 : i32
    return %c0_i32, %c0_i32_0 : i32, i32
  }
  func.func @transform_6(%arg0: i32) -> (i32, i32) {
    %c0_i32 = arith.constant 0 : i32
    %c0_i32_0 = arith.constant 0 : i32
    %c0_i32_1 = arith.constant 0 : i32
    return %c0_i32, %c0_i32_0 : i32, i32
  }
  func.func @transform_7(%arg0: i32) -> (i32, i32) {
    %c0_i32 = arith.constant 0 : i32
    %c0_i32_0 = arith.constant 0 : i32
    return %arg0, %c0_i32 : i32, i32
  }
}

module attributes {stable_mosaic.version = 11 : i64} {
  func.func @mlp_kernel(%arg0: i32, %arg1: memref<256x16xf32, #tpu.memory_space<vmem>>, %arg2: memref<16x128xbf16, #tpu.memory_space<vmem>>, %arg3: memref<1x128xf32, #tpu.memory_space<vmem>>, %arg4: memref<128x128xbf16, #tpu.memory_space<vmem>>, %arg5: memref<1x128xf32, #tpu.memory_space<vmem>>, %arg6: memref<128x8xbf16, #tpu.memory_space<vmem>>, %arg7: memref<1x8xf32, #tpu.memory_space<vmem>>, %arg8: memref<256x8xf32, #tpu.memory_space<vmem>>) attributes {dimension_semantics = [#tpu.dimension_semantics<parallel>], iteration_bounds = array<i64: 2>, scalar_prefetch = 0 : i64, scratch_operands = 0 : i64, tpu.core_type = #tpu.core_type<tc>, window_params = [{transform_indices = @transform_0, window_bounds = array<i64: 256, 16>}, {pipeline_mode = #tpu.pipeline_mode<synchronous>, transform_indices = @transform_1, window_bounds = array<i64: 16, 128>}, {pipeline_mode = #tpu.pipeline_mode<synchronous>, transform_indices = @transform_2, window_bounds = array<i64: 1, 128>}, {pipeline_mode = #tpu.pipeline_mode<synchronous>, transform_indices = @transform_3, window_bounds = array<i64: 128, 128>}, {pipeline_mode = #tpu.pipeline_mode<synchronous>, transform_indices = @transform_4, window_bounds = array<i64: 1, 128>}, {pipeline_mode = #tpu.pipeline_mode<synchronous>, transform_indices = @transform_5, window_bounds = array<i64: 128, 8>}, {pipeline_mode = #tpu.pipeline_mode<synchronous>, transform_indices = @transform_6, window_bounds = array<i64: 1, 8>}, {transform_indices = @transform_7, window_bounds = array<i64: 256, 8>}]} {
    %c0 = arith.constant 0 : index
    %c0_0 = arith.constant 0 : index
    %0 = vector.load %arg1[%c0, %c0_0] : memref<256x16xf32, #tpu.memory_space<vmem>>, vector<256x16xf32>
    %1 = arith.truncf %0 : vector<256x16xf32> to vector<256x16xbf16>
    %c0_1 = arith.constant 0 : index
    %c0_2 = arith.constant 0 : index
    %2 = vector.load %arg2[%c0_1, %c0_2] : memref<16x128xbf16, #tpu.memory_space<vmem>>, vector<16x128xbf16>
    %cst = arith.constant dense<0.000000e+00> : vector<256x128xf32>
    %3 = tpu.matmul %1, %2, %cst {dimension_numbers = #tpu.dot_dimension_numbers<[1], [0], [0], [1], [0, 0, 1, 1], [], []>} : vector<256x16xbf16>, vector<16x128xbf16>, vector<256x128xf32> -> vector<256x128xf32>
    %c0_3 = arith.constant 0 : index
    %c0_4 = arith.constant 0 : index
    %4 = vector.load %arg3[%c0_3, %c0_4] : memref<1x128xf32, #tpu.memory_space<vmem>>, vector<1x128xf32>
    %5 = vector.broadcast %4 : vector<1x128xf32> to vector<256x128xf32>
    %6 = arith.addf %3, %5 : vector<256x128xf32>
    %cst_5 = arith.constant 0.000000e+00 : f32
    %7 = vector.broadcast %cst_5 : f32 to vector<256x128xf32>
    %8 = arith.maximumf %6, %7 : vector<256x128xf32>
    %9 = arith.truncf %8 : vector<256x128xf32> to vector<256x128xbf16>
    %c0_6 = arith.constant 0 : index
    %c0_7 = arith.constant 0 : index
    %10 = vector.load %arg4[%c0_6, %c0_7] : memref<128x128xbf16, #tpu.memory_space<vmem>>, vector<128x128xbf16>
    %cst_8 = arith.constant dense<0.000000e+00> : vector<256x128xf32>
    %11 = tpu.matmul %9, %10, %cst_8 {dimension_numbers = #tpu.dot_dimension_numbers<[1], [0], [0], [1], [0, 0, 1, 1], [], []>} : vector<256x128xbf16>, vector<128x128xbf16>, vector<256x128xf32> -> vector<256x128xf32>
    %c0_9 = arith.constant 0 : index
    %c0_10 = arith.constant 0 : index
    %12 = vector.load %arg5[%c0_9, %c0_10] : memref<1x128xf32, #tpu.memory_space<vmem>>, vector<1x128xf32>
    %13 = vector.broadcast %12 : vector<1x128xf32> to vector<256x128xf32>
    %14 = arith.addf %11, %13 : vector<256x128xf32>
    %cst_11 = arith.constant 0.000000e+00 : f32
    %15 = vector.broadcast %cst_11 : f32 to vector<256x128xf32>
    %16 = arith.maximumf %14, %15 : vector<256x128xf32>
    %17 = arith.truncf %16 : vector<256x128xf32> to vector<256x128xbf16>
    %c0_12 = arith.constant 0 : index
    %c0_13 = arith.constant 0 : index
    %18 = vector.load %arg6[%c0_12, %c0_13] : memref<128x8xbf16, #tpu.memory_space<vmem>>, vector<128x8xbf16>
    %cst_14 = arith.constant dense<0.000000e+00> : vector<256x8xf32>
    %19 = tpu.matmul %17, %18, %cst_14 {dimension_numbers = #tpu.dot_dimension_numbers<[1], [0], [0], [1], [0, 0, 1, 1], [], []>} : vector<256x128xbf16>, vector<128x8xbf16>, vector<256x8xf32> -> vector<256x8xf32>
    %c0_15 = arith.constant 0 : index
    %c0_16 = arith.constant 0 : index
    %20 = vector.load %arg7[%c0_15, %c0_16] : memref<1x8xf32, #tpu.memory_space<vmem>>, vector<1x8xf32>
    %21 = vector.broadcast %20 : vector<1x8xf32> to vector<256x8xf32>
    %22 = arith.addf %19, %21 : vector<256x8xf32>
    %c0_17 = arith.constant 0 : index
    %c0_18 = arith.constant 0 : index
    %23 = vector.load %arg8[%c0_17, %c0_18] : memref<256x8xf32, #tpu.memory_space<vmem>>, vector<256x8xf32>
    tpu.vector_store %arg8[%c0_17, %c0_18], %22 {strides = array<i32>} : memref<256x8xf32, #tpu.memory_space<vmem>>, vector<256x8xf32>,
    return
  }
  func.func @transform_0(%arg0: i32) -> (i32, i32) {
    %c0_i32 = arith.constant 0 : i32
    %c0_i32_0 = arith.constant 0 : i32
    return %arg0, %c0_i32 : i32, i32
  }
  func.func @transform_1(%arg0: i32) -> (i32, i32) {
    %c0_i32 = arith.constant 0 : i32
    %c0_i32_0 = arith.constant 0 : i32
    %c0_i32_1 = arith.constant 0 : i32
    return %c0_i32, %c0_i32_0 : i32, i32
  }
  func.func @transform_2(%arg0: i32) -> (i32, i32) {
    %c0_i32 = arith.constant 0 : i32
    %c0_i32_0 = arith.constant 0 : i32
    %c0_i32_1 = arith.constant 0 : i32
    return %c0_i32, %c0_i32_0 : i32, i32
  }
  func.func @transform_3(%arg0: i32) -> (i32, i32) {
    %c0_i32 = arith.constant 0 : i32
    %c0_i32_0 = arith.constant 0 : i32
    %c0_i32_1 = arith.constant 0 : i32
    return %c0_i32, %c0_i32_0 : i32, i32
  }
  func.func @transform_4(%arg0: i32) -> (i32, i32) {
    %c0_i32 = arith.constant 0 : i32
    %c0_i32_0 = arith.constant 0 : i32
    %c0_i32_1 = arith.constant 0 : i32
    return %c0_i32, %c0_i32_0 : i32, i32
  }
  func.func @transform_5(%arg0: i32) -> (i32, i32) {
    %c0_i32 = arith.constant 0 : i32
    %c0_i32_0 = arith.constant 0 : i32
    %c0_i32_1 = arith.constant 0 : i32
    return %c0_i32, %c0_i32_0 : i32, i32
  }
  func.func @transform_6(%arg0: i32) -> (i32, i32) {
    %c0_i32 = arith.constant 0 : i32
    %c0_i32_0 = arith.constant 0 : i32
    %c0_i32_1 = arith.constant 0 : i32
    return %c0_i32, %c0_i32_0 : i32, i32
  }
  func.func @transform_7(%arg0: i32) -> (i32, i32) {
    %c0_i32 = arith.constant 0 : i32
    %c0_i32_0 = arith.constant 0 : i32
    return %arg0, %c0_i32 : i32, i32
  }
}

</mosaic_0001>

<bundles_post_ra>
// kernel: tpu_custom_call.1
= control target key start
LH: loop header
LB: loop body
LE: loop exit
PB: predicated region body
PF: predicated region fallthrough
CT: control target
= control target key end

     0   :  { %s1999_s24 = smov 0   ;;  %s2001_s25 = smov 0   ;;  %s2460_s0 = inlined_call_operand.vmem [shape: f32[500,16], index: 0, kind: input, shape index: {}]   ;;  %s2461_s1 = inlined_call_operand.vmem [shape: bf16[16,128], index: 1, kind: input, shape index: {}]   ;;  %s2462_s2 = inlined_call_operand.vmem [shape: f32[1,128], index: 2, kind: input, shape index: {}]   ;;  %s2463_s3 = inlined_call_operand.vmem [shape: bf16[128,128], index: 3, kind: input, shape index: {}]   ;;  %s2464_s4 = inlined_call_operand.vmem [shape: f32[1,128], index: 4, kind: input, shape index: {}]   ;;  %s2465_s5 = inlined_call_operand.vmem [shape: bf16[128,8], index: 5, kind: input, shape index: {}]   ;;  %s2466_s6 = inlined_call_operand.vmem [shape: f32[1,8], index: 6, kind: input, shape index: {}]   ;;  %s2467_s7 = inlined_call_operand.vmem [shape: f32[500,8], index: 7, kind: output, shape index: {}]  }
   0x1   :  { %s2003_s26 = smov 0  }
   0x2 LB: > { %s2012_s27 = sadd.s32 4294967295, %s1925_s26   ;;  %s2014_s28 = sadd.s32 1, %s1925_s26   ;;  %s1925_s26 = sphi %s2003_s26, %s2476_s26   ;;  %s1921_s25 = sphi %s2001_s25, %s2475_s25   ;;  %s1917_s24 = sphi %s1999_s24, %s2474_s24  }
   0x3   : > { %s173_s29 = ssub.s32 %s1925_s26, %s2014_s28  ;;  %s176_s30 = sadd.s32 1, %s1921_s25 }
   0x4   : > { %p174_p0 = scmp.eq.s32.totalorder %s173_s29, 0  ;;  %p186_p1 = scmp.ne.s32.totalorder %s1921_s25, %s1917_s24 }
   0x5   : > { %p187_p2 = scmp.eq.s32.totalorder %s2012_s27, 1  ;;  %p1509_p3 = scmp.ge.s32.totalorder %s1925_s26, 1 }
   0x6   : > { %s2022_s8 = scalar_select %p174_p0, %s1921_s25, %s176_s30  }
   0x7   : > { %p2024_p4 = por %p187_p2, %p186_p1  ;;  %p246_p5 = scmp.lt.s32.totalorder %s1925_s26, 3 }
   0x9   : > { %p247_p6 = pnand %p1509_p3, %p246_p5 }
   0xa   : > { %v1854_v0 = vld [vmem:[%s2461_s1] sm:$0xff] (!%p247_p6)   ;;  %s2032_s12 = sshll.u32 (!%p247_p6), %s2012_s27, 5  ;;  %vm364_vm0 = vcmask (!%p247_p6), 130048   ;;  %v1856_v23 = vld [vmem:[%s2463_s3 + $0x8] sm:$0xff] (!%p247_p6)   ;;  %v1857_v28 = vld [vmem:[%s2463_s3 + $0x10] sm:$0xff] (!%p247_p6)   ;;  %s278_s22 = sand.u32 (!%p247_p6), 1, %s1917_s24  }
   0xb   : > { %250 = sbr.rel (%p247_p6) target bundleno = 800 (0x320), region = 48  ;;  %p286_p7 = scmp.lt.s32.totalorder (!%p247_p6), %s2032_s12, 62  ;;  %1634 = vmatprep.subr.bf16.mxu0 (!%p247_p6), %v1854_v0  ;;  %1764 = vmatprep.subr.bf16.mxu1 (!%p247_p6), %v1854_v0  ;;  %v1855_v1 = vld [vmem:[%s2463_s3] sm:$0xff] (!%p247_p6)   ;;  %v1858_v37 = vld [vmem:[%s2463_s3 + $0x18] sm:$0xff] (!%p247_p6)   ;;  %v1860_v50 = vld [vmem:[%s2463_s3 + $0x28] sm:$0xff] (!%p247_p6)   ;;  %vm1134_vm1 = vcmask (!%p247_p6), 64512  }
   0xc   : > { %1635 = vmatpush3.bf16.msra.mxu0 (!%p247_p6), %v1854_v0  ;;  %1765 = vmatpush3.bf16.msra.mxu1 (!%p247_p6), %v1854_v0  ;;  %v1859_v45 = vld [vmem:[%s2463_s3 + $0x20] sm:$0xff] (!%p247_p6)   ;;  %v1861_v55 = vld [vmem:[%s2463_s3 + $0x30] sm:$0xff] (!%p247_p6)   ;;  %v1862_v56 = vld [vmem:[%s2463_s3 + $0x38] sm:$0xff] (!%p247_p6)   ;;  %s1510_s23 = sshll.u32 (!%p247_p6), %s278_s22, 8 }
   0xd   : > { %1668 = vmatprep.subr.bf16.mxu1 (!%p247_p6), %v1855_v1  ;;  %v1863_v57 = vld [vmem:[%s2465_s5] sm:$0xff] (!%p247_p6)   ;;  %v1864_v58 = vld [vmem:[%s2465_s5 + $0x8] sm:$0xff] (!%p247_p6)   ;;  %v1865_v59 = vld [vmem:[%s2465_s5 + $0x10] sm:$0xff] (!%p247_p6)   ;;  %s2225_s30 = scalar_lea.vmem (!%p247_p6), [#allocation2], %s1510_s23  }
   0xe   : > { %1716 = vmatprep.subr.bf16.mxu0 (!%p247_p6), %v1863_v57  ;;  %v1866_v60 = vld [vmem:[%s2465_s5 + $0x18] sm:$0xff] (!%p247_p6)   ;;  %v1867_v61 = vld [vmem:[%s2465_s5 + $0x20] sm:$0xff] (!%p247_p6)   ;;  %v1868_v62 = vld [vmem:[%s2465_s5 + $0x28] sm:$0xff] (!%p247_p6)  }
   0xf   : > { %v2134_v63 = vld [vmem:[%s2462_s2] ss:$0 sm:$0xff] (!%p247_p6) }
  0x12   : > { %s287_s15 = scalar_select %p286_p7, %s2032_s12, 62 }
  0x13   : > { %s1175_s24 = ssub.s32 (%p2024_p4), 63, %s2032_s12  ;;  %s1566_s10 = sshll.u32 (%p2024_p4), %s2012_s27, 8 }
  0x14   : > { %s1512_s16 = sshll.u32 %s287_s15, 3  ;;  %p1176_p8 = scmp.lt.s32.totalorder (%p2024_p4), %s1175_s24, 32 }
  0x15   : > { %s2042_s19 = scalar_lea.vmem %s2460_s0, %s1512_s16  ;;  %s2328_s14 = scalar_lea.vmem (%p2024_p4), %s2467_s7, %s1566_s10  }
  0x16   : > { %v301_v2 = vld [vmem:[%s2042_s19] sm:$0xff]  ;;  %v302_v3 = vld [vmem:[%s2042_s19 + $0x8] sm:$0xff]  ;;  %v303_v4 = vld [vmem:[%s2042_s19 + $0x10] sm:$0xff] }
  0x17   : > { %v333_v5 = vpack.c.bf16 %v302_v3, %v301_v2  ;;  %v304_v6 = vld [vmem:[%s2042_s19 + $0x18] sm:$0xff]  ;;  %v305_v7 = vld [vmem:[%s2042_s19 + $0x20] sm:$0xff]  ;;  %v306_v8 = vld [vmem:[%s2042_s19 + $0x28] sm:$0xff] }
  0x18   : > { %v334_v9 = vpack.c.bf16 %v304_v6, %v303_v4  ;;  %v335_v10 = vpack.c.bf16 %v306_v8, %v305_v7  ;;  %v307_v11 = vld [vmem:[%s2042_s19 + $0x30] sm:$0xff]  ;;  %v308_v12 = vld [vmem:[%s2042_s19 + $0x38] sm:$0xff]  ;;  %v309_v13 = vld [vmem:[%s2042_s19 + $0x40] sm:$0xff] }
  0x19   : > { %1636 = vmatprep.mubr.msk.bf16.mxu0 %vm364_vm0, %v333_v5  ;;  %v310_v14 = vld [vmem:[%s2042_s19 + $0x48] sm:$0xff]  ;;  %v317_v15 = vld [vmem:[%s2042_s19 + $0x80] sm:$0xff]  ;;  %v319_v18 = vld [vmem:[%s2042_s19 + $0x90] sm:$0xff]  ;;  %v336_v24 = vpack.c.bf16 %v308_v12, %v307_v11 }
  0x1a   : > { %1637 = vmatmul.mubr.msk.bf16.vlgmr.msra.gmra.mrb[0].mxu0 %vm364_vm0, %v334_v9  ;;  %v318_v16 = vld [vmem:[%s2042_s19 + $0x88] sm:$0xff]  ;;  %v320_v19 = vld [vmem:[%s2042_s19 + $0x98] sm:$0xff]  ;;  %v321_v20 = vld [vmem:[%s2042_s19 + $0xa0] sm:$0xff]  ;;  %v337_v26 = vpack.c.bf16 %v310_v14, %v309_v13 }
  0x1b   : > { %1640 = vmatprep.mubr.msk.bf16.mxu0 %vm364_vm0, %v335_v10  ;;  %v341_v17 = vpack.c.bf16 %v318_v16, %v317_v15  ;;  %v342_v21 = vpack.c.bf16 %v320_v19, %v319_v18  ;;  %v322_v22 = vld [vmem:[%s2042_s19 + $0xa8] sm:$0xff]  ;;  %v323_v27 = vld [vmem:[%s2042_s19 + $0xb0] sm:$0xff]  ;;  %v324_v29 = vld [vmem:[%s2042_s19 + $0xb8] sm:$0xff]  ;;  %1717 = vmatpush3.bf16.msra.mxu0 %v1863_v57 }
  0x1c   : > { %v343_v25 = vpack.c.bf16 %v322_v22, %v321_v20  ;;  %v325_v30 = vld [vmem:[%s2042_s19 + $0xc0] sm:$0xff]  ;;  %v326_v31 = vld [vmem:[%s2042_s19 + $0xc8] sm:$0xff]  ;;  %v311_v32 = vld [vmem:[%s2042_s19 + $0x50] sm:$0xff]  ;;  %v344_v36 = vpack.c.bf16 %v324_v29, %v323_v27  ;;  %1718 = vmatprep.subr.bf16.mxu0 %v1864_v58 }
  0x1d   : > { %1652 = vmatprep.mubr.msk.bf16.mxu1 %vm364_vm0, %v341_v17  ;;  %v312_v33 = vld [vmem:[%s2042_s19 + $0x58] sm:$0xff]  ;;  %v313_v34 = vld [vmem:[%s2042_s19 + $0x60] sm:$0xff]  ;;  %v314_v35 = vld [vmem:[%s2042_s19 + $0x68] sm:$0xff]  ;;  %v345_v38 = vpack.c.bf16 %v326_v31, %v325_v30 }
  0x1e   : > { %1653 = vmatmul.mubr.msk.bf16.vlgmr.msra.gmra.mrb[0].mxu1 %vm364_vm0, %v342_v21  ;;  %v338_v39 = vpack.c.bf16 %v312_v33, %v311_v32  ;;  %v339_v40 = vpack.c.bf16 %v314_v35, %v313_v34  ;;  %v327_v41 = vld [vmem:[%s2042_s19 + $0xd0] sm:$0xff]  ;;  %v328_v42 = vld [vmem:[%s2042_s19 + $0xd8] sm:$0xff]  ;;  %v329_v43 = vld [vmem:[%s2042_s19 + $0xe0] sm:$0xff] }
  0x1f   : > { %1656 = vmatprep.mubr.msk.bf16.mxu1 %vm364_vm0, %v343_v25  ;;  %1669 = vmatpush3.bf16.msra.mxu1 %v1855_v1  ;;  %v330_v44 = vld [vmem:[%s2042_s19 + $0xe8] sm:$0xff]  ;;  %v315_v46 = vld [vmem:[%s2042_s19 + $0x70] sm:$0xff]  ;;  %v316_v47 = vld [vmem:[%s2042_s19 + $0x78] sm:$0xff]  ;;  %v346_v48 = vpack.c.bf16 %v328_v42, %v327_v41 }
  0x20   : > { %1670 = vmatprep.subr.bf16.mxu1 %v1856_v23  ;;  %v347_v49 = vpack.c.bf16 %v330_v44, %v329_v43  ;;  %v340_v51 = vpack.c.bf16 %v316_v47, %v315_v46  ;;  %v331_v52 = vld [vmem:[%s2042_s19 + $0xf0] sm:$0xff]  ;;  %v332_v53 = vld [vmem:[%s2042_s19 + $0xf8] sm:$0xff]  ;;  %1719 = vmatpush3.bf16.msra.mxu0 %v1864_v58 }
  0x21   : > { %v348_v54 = vpack.c.bf16 %v332_v53, %v331_v52  ;;  %1720 = vmatprep.subr.bf16.mxu0 %v1865_v59 }
  0x22   : > { %1641 = vmatmul.mubr.msk.bf16.gmra.mrb[4].mxu0 %vm364_vm0, %v336_v24 }
  0x23   : > { %1644 = vmatprep.mubr.msk.bf16.mxu0 %vm364_vm0, %v337_v26  ;;  %1671 = vmatpush3.bf16.msra.mxu1 %v1856_v23 }
  0x24   : > { %1672 = vmatprep.subr.bf16.mxu1 %v1857_v28  ;;  %1721 = vmatpush3.bf16.msra.mxu0 %v1865_v59 }
  0x25   : > { %1722 = vmatprep.subr.bf16.mxu0 %v1866_v60 }
  0x26   : > { %1657 = vmatmul.mubr.msk.bf16.gmra.mrb[4].mxu1 %vm364_vm0, %v344_v36 }
  0x27   : > { %1660 = vmatprep.mubr.msk.bf16.mxu1 %vm364_vm0, %v345_v38  ;;  %1673 = vmatpush3.bf16.msra.mxu1 %v1857_v28 }
  0x28   : > { %1674 = vmatprep.subr.bf16.mxu1 %v1858_v37  ;;  %1723 = vmatpush3.bf16.msra.mxu0 %v1866_v60 }
  0x29   : > { %1724 = vmatprep.subr.bf16.mxu0 %v1867_v61 }
  0x2a   : > { %1645 = vmatmul.mubr.msk.bf16.gmra.mrb[8].mxu0 %vm364_vm0, %v338_v39 }
  0x2b   : > { %1648 = vmatprep.mubr.msk.bf16.mxu0 %vm364_vm0, %v339_v40  ;;  %1675 = vmatpush3.bf16.msra.mxu1 %v1858_v37 }
  0x2c   : > { %1676 = vmatprep.subr.bf16.mxu1 %v1859_v45  ;;  %1725 = vmatpush3.bf16.msra.mxu0 %v1867_v61 }
  0x2d   : > { %1726 = vmatprep.subr.bf16.mxu0 %v1868_v62 }
  0x2e   : > { %1661 = vmatmul.mubr.msk.bf16.gmra.mrb[8].mxu1 %vm364_vm0, %v346_v48 }
  0x2f   : > { %1664 = vmatprep.mubr.msk.bf16.mxu1 %vm364_vm0, %v347_v49  ;;  %1677 = vmatpush3.bf16.msra.mxu1 %v1859_v45 }
  0x30   : > { %1678 = vmatprep.subr.bf16.mxu1 %v1860_v50  ;;  %1727 = vmatpush3.bf16.msra.mxu0 %v1868_v62 }
  0x32   : > { %1649 = vmatmul.mubr.msk.bf16.gmra.mrb[12].mxu0 %vm364_vm0, %v340_v51 }
  0x33   : > { %1679 = vmatpush3.bf16.msra.mxu1 %v1860_v50 }
  0x34   : > { %1680 = vmatprep.subr.bf16.mxu1 %v1861_v55 }
  0x36   : > { %1665 = vmatmul.mubr.msk.bf16.gmra.mrb[12].mxu1 %vm364_vm0, %v348_v54 }
  0x37   : > { %1681 = vmatpush3.bf16.msra.mxu1 %v1861_v55 }
  0x38   : > { %1682 = vmatprep.subr.bf16.mxu1 %v1862_v56 }
  0x3b   : > { %1683 = vmatpush3.bf16.msra.mxu1 %v1862_v56 }
  0xed   : > { %v1638_v0 = vpop.f32.mrb[0].mxu0 }
  0xee   : > { %v456_v1 = vadd.f32 %v1638_v0, %v2134_v63  ;;  %v447_v2 = vpop.f32.mrb[1].mxu0 }
  0xef   : > { %v448_v3 = vadd.f32 %v2134_v63, %v447_v2  ;;  %v1639_v4 = vpop.f32.mrb[2].mxu0 }
  0xf0   : > { %v459_v5 = vadd.f32 %v1639_v4, %v2134_v63  ;;  %v450_v6 = vpop.f32.mrb[3].mxu0  ;;  %v576_v8 = vmax.f32 %v456_v1, 0.0 }
  0xf1   : > { %v451_v7 = vadd.f32 %v2134_v63, %v450_v6  ;;  %v1654_v10 = vpop.f32.mrb[0].mxu1  ;;  %v574_v11 = vmax.f32 %v448_v3, 0.0 }
  0xf2   : > { %v577_v9 = vmax.f32 %v459_v5, 0.0  ;;  %v520_v13 = vadd.f32 %v1654_v10, %v2134_v63  ;;  %v511_v14 = vpop.f32.mrb[1].mxu1 }
  0xf3   : > { %v575_v12 = vmax.f32 %v451_v7, 0.0  ;;  %v512_v16 = vadd.f32 %v2134_v63, %v511_v14  ;;  %v1655_v17 = vpop.f32.mrb[2].mxu1 }
  0xf4   : > { %v607_v15 = vpack.c.bf16 %v577_v9, %v576_v8  ;;  %v592_v20 = vmax.f32 %v520_v13, 0.0  ;;  %v523_v21 = vadd.f32 %v1655_v17, %v2134_v63  ;;  %v514_v22 = vpop.f32.mrb[3].mxu1 }
  0xf5   : > { %v606_v18 = vpack.c.bf16 %v575_v12, %v574_v11  ;;  %v1642_v19 = vpop.f32.mrb[4].mxu0  ;;  %v590_v25 = vmax.f32 %v512_v16, 0.0  ;;  %v515_v26 = vadd.f32 %v2134_v63, %v514_v22 }
  0xf6   : > { %v472_v23 = vadd.f32 %v1642_v19, %v2134_v63  ;;  %v463_v24 = vpop.f32.mrb[5].mxu0  ;;  %v593_v29 = vmax.f32 %v523_v21, 0.0 }
  0xf7   : > { %v464_v27 = vadd.f32 %v2134_v63, %v463_v24  ;;  %v1643_v28 = vpop.f32.mrb[6].mxu0  ;;  %1684 = vmatprep.mubr.bf16.mxu1 %v606_v18  ;;  %v591_v32 = vmax.f32 %v515_v26, 0.0 }
  0xf8   : > { %v475_v30 = vadd.f32 %v1643_v28, %v2134_v63  ;;  %v466_v31 = vpop.f32.mrb[7].mxu0  ;;  %1685 = vmatmul.mubr.bf16.vlgmr.msra.gmra.mrb[16].mxu1 %v607_v15  ;;  %v2148_v34 = vpack.c.bf16 %v593_v29, %v592_v20  ;;  %v580_v35 = vmax.f32 %v472_v23, 0.0 }
  0xf9   : > { %v467_v33 = vadd.f32 %v2134_v63, %v466_v31  ;;  %v2150_v37 = vpack.c.bf16 %v591_v32, %v590_v25  ;;  %v1658_v38 = vpop.f32.mrb[4].mxu1  ;;  %v578_v39 = vmax.f32 %v464_v27, 0.0 }
  0xfa   : > { %v581_v36 = vmax.f32 %v475_v30, 0.0  ;;  %v536_v41 = vadd.f32 %v1658_v38, %v2134_v63  ;;  %v527_v42 = vpop.f32.mrb[5].mxu1 }
  0xfb   : > { %v579_v40 = vmax.f32 %v467_v33, 0.0  ;;  %v528_v44 = vadd.f32 %v2134_v63, %v527_v42  ;;  %v1659_v45 = vpop.f32.mrb[6].mxu1 }
  0xfc   : > { %v609_v43 = vpack.c.bf16 %v581_v36, %v580_v35  ;;  %v596_v48 = vmax.f32 %v536_v41, 0.0  ;;  %v539_v49 = vadd.f32 %v1659_v45, %v2134_v63  ;;  %v530_v50 = vpop.f32.mrb[7].mxu1 }
  0xfd   : > { %v608_v46 = vpack.c.bf16 %v579_v40, %v578_v39  ;;  %v1646_v47 = vpop.f32.mrb[8].mxu0  ;;  %v594_v53 = vmax.f32 %v528_v44, 0.0  ;;  %v531_v54 = vadd.f32 %v2134_v63, %v530_v50 }
  0xfe   : > { %v488_v51 = vadd.f32 %v1646_v47, %v2134_v63  ;;  %v479_v52 = vpop.f32.mrb[9].mxu0  ;;  %v597_v57 = vmax.f32 %v539_v49, 0.0 }
  0xff   : > { %v480_v55 = vadd.f32 %v2134_v63, %v479_v52  ;;  %v1647_v56 = vpop.f32.mrb[10].mxu0  ;;  %1688 = vmatprep.mubr.bf16.mxu1 %v608_v46  ;;  %v595_v60 = vmax.f32 %v531_v54, 0.0 }
 0x100   : > { %v491_v58 = vadd.f32 %v1647_v56, %v2134_v63  ;;  %v482_v59 = vpop.f32.mrb[11].mxu0  ;;  %1689 = vmatmul.mubr.bf16.gmra.mrb[20].mxu1 %v609_v43  ;;  %v617_v62 = vpack.c.bf16 %v597_v57, %v596_v48  ;;  %v584_v0 = vmax.f32 %v488_v51, 0.0 }
 0x101   : > { %v483_v61 = vadd.f32 %v2134_v63, %v482_v59  ;;  %v616_v2 = vpack.c.bf16 %v595_v60, %v594_v53  ;;  %v1662_v3 = vpop.f32.mrb[8].mxu1  ;;  %v582_v4 = vmax.f32 %v480_v55, 0.0 }
 0x102   : > { %v585_v1 = vmax.f32 %v491_v58, 0.0  ;;  %v552_v6 = vadd.f32 %v1662_v3, %v2134_v63  ;;  %v543_v7 = vpop.f32.mrb[9].mxu1 }
 0x103   : > { %v583_v5 = vmax.f32 %v483_v61, 0.0  ;;  %v544_v9 = vadd.f32 %v2134_v63, %v543_v7  ;;  %v1663_v10 = vpop.f32.mrb[10].mxu1 }
 0x104   : > { %v611_v8 = vpack.c.bf16 %v585_v1, %v584_v0  ;;  %v600_v13 = vmax.f32 %v552_v6, 0.0  ;;  %v555_v14 = vadd.f32 %v1663_v10, %v2134_v63  ;;  %v546_v15 = vpop.f32.mrb[11].mxu1 }
 0x105   : > { %v610_v11 = vpack.c.bf16 %v583_v5, %v582_v4  ;;  %v1650_v12 = vpop.f32.mrb[12].mxu0  ;;  %v598_v18 = vmax.f32 %v544_v9, 0.0  ;;  %v547_v19 = vadd.f32 %v2134_v63, %v546_v15 }
 0x106   : > { %v504_v16 = vadd.f32 %v1650_v12, %v2134_v63  ;;  %v495_v17 = vpop.f32.mrb[13].mxu0  ;;  %v601_v22 = vmax.f32 %v555_v14, 0.0 }
 0x107   : > { %v496_v20 = vadd.f32 %v2134_v63, %v495_v17  ;;  %v1651_v21 = vpop.f32.mrb[14].mxu0  ;;  %1692 = vmatprep.mubr.bf16.mxu1 %v610_v11  ;;  %v599_v25 = vmax.f32 %v547_v19, 0.0 }
 0x108   : > { %v507_v23 = vadd.f32 %v1651_v21, %v2134_v63  ;;  %v498_v24 = vpop.f32.mrb[15].mxu0  ;;  %1693 = vmatmul.mubr.bf16.gmra.mrb[24].mxu1 %v611_v8  ;;  %v619_v27 = vpack.c.bf16 %v601_v22, %v600_v13  ;;  %v588_v28 = vmax.f32 %v504_v16, 0.0 }
 0x109   : > { %v499_v26 = vadd.f32 %v2134_v63, %v498_v24  ;;  %v618_v30 = vpack.c.bf16 %v599_v25, %v598_v18  ;;  %v1666_v31 = vpop.f32.mrb[12].mxu1  ;;  %v586_v32 = vmax.f32 %v496_v20, 0.0 }
 0x10a   : > { %v589_v29 = vmax.f32 %v507_v23, 0.0  ;;  %v568_v35 = vadd.f32 %v1666_v31, %v2134_v63  ;;  %v559_v36 = vpop.f32.mrb[13].mxu1 }
 0x10b   : > { %v587_v33 = vmax.f32 %v499_v26, 0.0  ;;  %v560_v39 = vadd.f32 %v2134_v63, %v559_v36  ;;  %v1667_v40 = vpop.f32.mrb[14].mxu1 }
 0x10c   : > { %v613_v38 = vpack.c.bf16 %v589_v29, %v588_v28  ;;  %v604_v42 = vmax.f32 %v568_v35, 0.0  ;;  %v571_v43 = vadd.f32 %v1667_v40, %v2134_v63  ;;  %v562_v44 = vpop.f32.mrb[15].mxu1 }
 0x10d   : > { %v612_v41 = vpack.c.bf16 %v587_v33, %v586_v32  ;;  %v602_v45 = vmax.f32 %v560_v39, 0.0  ;;  %v563_v46 = vadd.f32 %v2134_v63, %v562_v44  ;;  %v1869_v63 = vld [vmem:[%s2465_s5 + $0x30] sm:$0xff]  }
 0x10e   : > { %v605_v47 = vmax.f32 %v571_v43, 0.0  ;;  %1728 = vmatprep.subr.bf16.mxu0 %v1869_v63 }
 0x10f   : > { %1696 = vmatprep.mubr.bf16.mxu1 %v612_v41  ;;  %v603_v48 = vmax.f32 %v563_v46, 0.0  ;;  %1729 = vmatpush3.bf16.msra.mxu0 %v1869_v63 }
 0x110   : > { %1697 = vmatmul.mubr.bf16.gmra.mrb[28].mxu1 %v613_v38  ;;  %v621_v49 = vpack.c.bf16 %v605_v47, %v604_v42 }
 0x111   : > { %1700 = vmatprep.mubr.bf16.mxu1 %v2150_v37  ;;  %v620_v50 = vpack.c.bf16 %v603_v48, %v602_v45  ;;  %v1870_v37 = vld [vmem:[%s2465_s5 + $0x38] sm:$0xff]  }
 0x112   : > { %1730 = vmatprep.subr.bf16.mxu0 %v1870_v37 }
 0x113   : > { %1731 = vmatpush3.bf16.msra.mxu0 %v1870_v37 }
 0x118   : > { %1701 = vmatmul.mubr.bf16.gmra.mrb[32].mxu1 %v2148_v34  ;;  %v2183_v34 = vld [vmem:[%s2464_s4] ss:$0 sm:$0xff] }
 0x119   : > { %1704 = vmatprep.mubr.bf16.mxu1 %v616_v2 }
 0x120   : > { %1705 = vmatmul.mubr.bf16.gmra.mrb[36].mxu1 %v617_v62 }
 0x121   : > { %1708 = vmatprep.mubr.bf16.mxu1 %v618_v30 }
 0x128   : > { %1709 = vmatmul.mubr.bf16.gmra.mrb[40].mxu1 %v619_v27 }
 0x129   : > { %1712 = vmatprep.mubr.bf16.mxu1 %v620_v50 }
 0x130   : > { %1713 = vmatmul.mubr.bf16.gmra.mrb[44].mxu1 %v621_v49 }
 0x1cb   : > { %v1686_v51 = vpop.f32.mrb[16].mxu1 }
 0x1cc   : > { %v736_v52 = vadd.f32 %v1686_v51, %v2183_v34  ;;  %v727_v53 = vpop.f32.mrb[17].mxu1 }
 0x1cd   : > { %v728_v54 = vadd.f32 %v2183_v34, %v727_v53  ;;  %v1687_v55 = vpop.f32.mrb[18].mxu1 }
 0x1ce   : > { %v739_v56 = vadd.f32 %v1687_v55, %v2183_v34  ;;  %v730_v57 = vpop.f32.mrb[19].mxu1  ;;  %v856_v59 = vmax.f32 %v736_v52, 0.0 }
 0x1cf   : > { %v731_v58 = vadd.f32 %v2183_v34, %v730_v57  ;;  %v854_v61 = vmax.f32 %v728_v54, 0.0 }
 0x1d0   : > { %v857_v60 = vmax.f32 %v739_v56, 0.0 }
 0x1d1   : > { %v855_v62 = vmax.f32 %v731_v58, 0.0 }
 0x1d2   : > { %v887_v0 = vpack.c.bf16 %v857_v60, %v856_v59 }
 0x1d3   : > { %v886_v1 = vpack.c.bf16 %v855_v62, %v854_v61  ;;  %v1690_v2 = vpop.f32.mrb[20].mxu1 }
 0x1d4   : > { %v752_v3 = vadd.f32 %v1690_v2, %v2183_v34  ;;  %v743_v4 = vpop.f32.mrb[21].mxu1 }
 0x1d5   : > { %v744_v5 = vadd.f32 %v2183_v34, %v743_v4  ;;  %v1691_v6 = vpop.f32.mrb[22].mxu1  ;;  %1732 = vmatprep.mubr.bf16.mxu0 %v886_v1 }
 0x1d6   : > { %v755_v7 = vadd.f32 %v1691_v6, %v2183_v34  ;;  %v746_v8 = vpop.f32.mrb[23].mxu1  ;;  %1733 = vmatmul.mubr.bf16.vlgmr.msra.gmra.mrb[16].mxu0 %v887_v0  ;;  %v860_v10 = vmax.f32 %v752_v3, 0.0 }
 0x1d7   : > { %v747_v9 = vadd.f32 %v2183_v34, %v746_v8  ;;  %v858_v12 = vmax.f32 %v744_v5, 0.0 }
 0x1d8   : > { %v861_v11 = vmax.f32 %v755_v7, 0.0 }
 0x1d9   : > { %v859_v13 = vmax.f32 %v747_v9, 0.0 }
 0x1da   : > { %v889_v14 = vpack.c.bf16 %v861_v11, %v860_v10 }
 0x1db   : > { %v888_v15 = vpack.c.bf16 %v859_v13, %v858_v12  ;;  %v1694_v16 = vpop.f32.mrb[24].mxu1 }
 0x1dc   : > { %v768_v17 = vadd.f32 %v1694_v16, %v2183_v34  ;;  %v759_v18 = vpop.f32.mrb[25].mxu1 }
 0x1dd   : > { %v760_v19 = vadd.f32 %v2183_v34, %v759_v18  ;;  %v1695_v20 = vpop.f32.mrb[26].mxu1  ;;  %1736 = vmatprep.mubr.bf16.mxu0 %v888_v15 }
 0x1de   : > { %v771_v21 = vadd.f32 %v1695_v20, %v2183_v34  ;;  %v762_v22 = vpop.f32.mrb[27].mxu1  ;;  %1737 = vmatmul.mubr.bf16.gmra.mrb[20].mxu0 %v889_v14  ;;  %v864_v24 = vmax.f32 %v768_v17, 0.0 }
 0x1df   : > { %v763_v23 = vadd.f32 %v2183_v34, %v762_v22  ;;  %v862_v26 = vmax.f32 %v760_v19, 0.0 }
 0x1e0   : > { %v865_v25 = vmax.f32 %v771_v21, 0.0 }
 0x1e1   : > { %v863_v27 = vmax.f32 %v763_v23, 0.0 }
 0x1e2   : > { %v891_v28 = vpack.c.bf16 %v865_v25, %v864_v24 }
 0x1e3   : > { %v890_v29 = vpack.c.bf16 %v863_v27, %v862_v26  ;;  %v1698_v30 = vpop.f32.mrb[28].mxu1 }
 0x1e4   : > { %v784_v31 = vadd.f32 %v1698_v30, %v2183_v34  ;;  %v775_v32 = vpop.f32.mrb[29].mxu1 }
 0x1e5   : > { %v776_v33 = vadd.f32 %v2183_v34, %v775_v32  ;;  %v1699_v35 = vpop.f32.mrb[30].mxu1  ;;  %1740 = vmatprep.mubr.bf16.mxu0 %v890_v29 }
 0x1e6   : > { %v787_v36 = vadd.f32 %v1699_v35, %v2183_v34  ;;  %v778_v38 = vpop.f32.mrb[31].mxu1  ;;  %1741 = vmatmul.mubr.bf16.gmra.mrb[24].mxu0 %v891_v28  ;;  %v868_v40 = vmax.f32 %v784_v31, 0.0 }
 0x1e7   : > { %v779_v39 = vadd.f32 %v2183_v34, %v778_v38  ;;  %v866_v42 = vmax.f32 %v776_v33, 0.0 }
 0x1e8   : > { %v869_v41 = vmax.f32 %v787_v36, 0.0 }
 0x1e9   : > { %v867_v43 = vmax.f32 %v779_v39, 0.0  ;;  %v2221_v39 = vld [vmem:[%s2466_s6] ss:$0 sm:$0xff] }
 0x1ea   : > { %v893_v44 = vpack.c.bf16 %v869_v41, %v868_v40 }
 0x1eb   : > { %v892_v45 = vpack.c.bf16 %v867_v43, %v866_v42  ;;  %v1702_v46 = vpop.f32.mrb[32].mxu1 }
 0x1ec   : > { %v800_v47 = vadd.f32 %v1702_v46, %v2183_v34  ;;  %v791_v48 = vpop.f32.mrb[33].mxu1 }
 0x1ed   : > { %v792_v49 = vadd.f32 %v2183_v34, %v791_v48  ;;  %v1703_v50 = vpop.f32.mrb[34].mxu1  ;;  %1744 = vmatprep.mubr.bf16.mxu0 %v892_v45 }
 0x1ee   : > { %v803_v63 = vadd.f32 %v1703_v50, %v2183_v34  ;;  %v794_v37 = vpop.f32.mrb[35].mxu1  ;;  %1745 = vmatmul.mubr.bf16.gmra.mrb[28].mxu0 %v893_v44  ;;  %v872_v52 = vmax.f32 %v800_v47, 0.0 }
 0x1ef   : > { %v795_v51 = vadd.f32 %v2183_v34, %v794_v37  ;;  %v870_v54 = vmax.f32 %v792_v49, 0.0 }
 0x1f0   : > { %v873_v53 = vmax.f32 %v803_v63, 0.0 }
 0x1f1   : > { %v871_v55 = vmax.f32 %v795_v51, 0.0 }
 0x1f2   : > { %v895_v56 = vpack.c.bf16 %v873_v53, %v872_v52 }
 0x1f3   : > { %v894_v57 = vpack.c.bf16 %v871_v55, %v870_v54  ;;  %v1706_v58 = vpop.f32.mrb[36].mxu1 }
 0x1f4   : > { %v816_v59 = vadd.f32 %v1706_v58, %v2183_v34  ;;  %v807_v60 = vpop.f32.mrb[37].mxu1 }
 0x1f5   : > { %v808_v61 = vadd.f32 %v2183_v34, %v807_v60  ;;  %v1707_v62 = vpop.f32.mrb[38].mxu1  ;;  %1748 = vmatprep.mubr.bf16.mxu0 %v894_v57 }
 0x1f6   : > { %v819_v0 = vadd.f32 %v1707_v62, %v2183_v34  ;;  %v810_v1 = vpop.f32.mrb[39].mxu1  ;;  %1749 = vmatmul.mubr.bf16.gmra.mrb[32].mxu0 %v895_v56  ;;  %v876_v3 = vmax.f32 %v816_v59, 0.0 }
 0x1f7   : > { %v811_v2 = vadd.f32 %v2183_v34, %v810_v1  ;;  %v874_v5 = vmax.f32 %v808_v61, 0.0 }
 0x1f8   : > { %v877_v4 = vmax.f32 %v819_v0, 0.0 }
 0x1f9   : > { %v875_v6 = vmax.f32 %v811_v2, 0.0 }
 0x1fa   : > { %v897_v7 = vpack.c.bf16 %v877_v4, %v876_v3 }
 0x1fb   : > { %v896_v8 = vpack.c.bf16 %v875_v6, %v874_v5  ;;  %v1710_v9 = vpop.f32.mrb[40].mxu1 }
 0x1fc   : > { %v832_v10 = vadd.f32 %v1710_v9, %v2183_v34  ;;  %v823_v11 = vpop.f32.mrb[41].mxu1 }
 0x1fd   : > { %v824_v12 = vadd.f32 %v2183_v34, %v823_v11  ;;  %v1711_v13 = vpop.f32.mrb[42].mxu1  ;;  %1752 = vmatprep.mubr.bf16.mxu0 %v896_v8 }
 0x1fe   : > { %v835_v14 = vadd.f32 %v1711_v13, %v2183_v34  ;;  %v826_v15 = vpop.f32.mrb[43].mxu1  ;;  %1753 = vmatmul.mubr.bf16.gmra.mrb[36].mxu0 %v897_v7  ;;  %v880_v17 = vmax.f32 %v832_v10, 0.0 }
 0x1ff   : > { %v827_v16 = vadd.f32 %v2183_v34, %v826_v15  ;;  %v878_v19 = vmax.f32 %v824_v12, 0.0 }
 0x200   : > { %v881_v18 = vmax.f32 %v835_v14, 0.0 }
 0x201   : > { %v879_v20 = vmax.f32 %v827_v16, 0.0 }
 0x202   : > { %v899_v21 = vpack.c.bf16 %v881_v18, %v880_v17 }
 0x203   : > { %v898_v22 = vpack.c.bf16 %v879_v20, %v878_v19  ;;  %v1714_v23 = vpop.f32.mrb[44].mxu1 }
 0x204   : > { %v848_v24 = vadd.f32 %v1714_v23, %v2183_v34  ;;  %v839_v25 = vpop.f32.mrb[45].mxu1 }
 0x205   : > { %v840_v26 = vadd.f32 %v2183_v34, %v839_v25  ;;  %v1715_v27 = vpop.f32.mrb[46].mxu1  ;;  %1756 = vmatprep.mubr.bf16.mxu0 %v898_v22 }
 0x206   : > { %v851_v28 = vadd.f32 %v1715_v27, %v2183_v34  ;;  %v842_v29 = vpop.f32.mrb[47].mxu1  ;;  %1757 = vmatmul.mubr.bf16.gmra.mrb[40].mxu0 %v899_v21  ;;  %v884_v31 = vmax.f32 %v848_v24, 0.0 }
 0x207   : > { %v843_v30 = vadd.f32 %v2183_v34, %v842_v29  ;;  %v882_v33 = vmax.f32 %v840_v26, 0.0 }
 0x208   : > { %v885_v32 = vmax.f32 %v851_v28, 0.0 }
 0x209   : > { %v883_v35 = vmax.f32 %v843_v30, 0.0 }
 0x20a   : > { %v901_v36 = vpack.c.bf16 %v885_v32, %v884_v31 }
 0x20b   : > { %v900_v38 = vpack.c.bf16 %v883_v35, %v882_v33 }
 0x20d   : > { %1760 = vmatprep.mubr.bf16.mxu0 %v900_v38 }
 0x20e   : > { %1761 = vmatmul.mubr.bf16.gmra.mrb[44].mxu0 %v901_v36 }
 0x2a9   : > { %v1734_v40 = vpop.f32.mrb[16].mxu0 }
 0x2aa   : > { %v1016_v41 = vadd.f32 %v1734_v40, %v2221_v39  ;;  %v1007_v34 = vpop.f32.mrb[17].mxu0 }
 0x2ab   : > { %v1008_v42 = vadd.f32 %v2221_v39, %v1007_v34  ;;  %v1735_v43 = vpop.f32.mrb[18].mxu0 }
 0x2ac   : > { %1137 = vst.msk [vmem:[%s2225_s30 + $0x10] sm:$0xff] %vm1134_vm1, %v1016_v41  ;;  %v1019_v44 = vadd.f32 %v1735_v43, %v2221_v39  ;;  %v1010_v45 = vpop.f32.mrb[19].mxu0 }
 0x2ad   : > { %1135 = vst.msk [vmem:[%s2225_s30] sm:$0xff] %vm1134_vm1, %v1008_v42  ;;  %v1011_v46 = vadd.f32 %v2221_v39, %v1010_v45 }
 0x2ae   : > { %1138 = vst.msk [vmem:[%s2225_s30 + $0x18] sm:$0xff] %vm1134_vm1, %v1019_v44 }
 0x2af   : > { %1136 = vst.msk [vmem:[%s2225_s30 + $0x8] sm:$0xff] %vm1134_vm1, %v1011_v46 }
 0x2b1   : > { %v1738_v47 = vpop.f32.mrb[20].mxu0 }
 0x2b2   : > { %v1032_v48 = vadd.f32 %v1738_v47, %v2221_v39  ;;  %v1023_v49 = vpop.f32.mrb[21].mxu0 }
 0x2b3   : > { %v1024_v50 = vadd.f32 %v2221_v39, %v1023_v49  ;;  %v1739_v63 = vpop.f32.mrb[22].mxu0 }
 0x2b4   : > { %1141 = vst.msk [vmem:[%s2225_s30 + $0x30] sm:$0xff] %vm1134_vm1, %v1032_v48  ;;  %v1035_v37 = vadd.f32 %v1739_v63, %v2221_v39  ;;  %v1026_v51 = vpop.f32.mrb[23].mxu0 }
 0x2b5   : > { %1139 = vst.msk [vmem:[%s2225_s30 + $0x20] sm:$0xff] %vm1134_vm1, %v1024_v50  ;;  %v1027_v52 = vadd.f32 %v2221_v39, %v1026_v51 }
 0x2b6   : > { %1142 = vst.msk [vmem:[%s2225_s30 + $0x38] sm:$0xff] %vm1134_vm1, %v1035_v37 }
 0x2b7   : > { %1140 = vst.msk [vmem:[%s2225_s30 + $0x28] sm:$0xff] %vm1134_vm1, %v1027_v52 }
 0x2b9   : > { %v1742_v53 = vpop.f32.mrb[24].mxu0 }
 0x2ba   : > { %v1048_v54 = vadd.f32 %v1742_v53, %v2221_v39  ;;  %v1039_v55 = vpop.f32.mrb[25].mxu0 }
 0x2bb   : > { %v1040_v56 = vadd.f32 %v2221_v39, %v1039_v55  ;;  %v1743_v57 = vpop.f32.mrb[26].mxu0 }
 0x2bc   : > { %1145 = vst.msk [vmem:[%s2225_s30 + $0x50] sm:$0xff] %vm1134_vm1, %v1048_v54  ;;  %v1051_v58 = vadd.f32 %v1743_v57, %v2221_v39  ;;  %v1042_v59 = vpop.f32.mrb[27].mxu0 }
 0x2bd   : > { %1143 = vst.msk [vmem:[%s2225_s30 + $0x40] sm:$0xff] %vm1134_vm1, %v1040_v56  ;;  %v1043_v60 = vadd.f32 %v2221_v39, %v1042_v59 }
 0x2be   : > { %1146 = vst.msk [vmem:[%s2225_s30 + $0x58] sm:$0xff] %vm1134_vm1, %v1051_v58 }
 0x2bf   : > { %1144 = vst.msk [vmem:[%s2225_s30 + $0x48] sm:$0xff] %vm1134_vm1, %v1043_v60 }
 0x2c1   : > { %v1746_v61 = vpop.f32.mrb[28].mxu0 }
 0x2c2   : > { %v1064_v62 = vadd.f32 %v1746_v61, %v2221_v39  ;;  %v1055_v0 = vpop.f32.mrb[29].mxu0 }
 0x2c3   : > { %v1056_v1 = vadd.f32 %v2221_v39, %v1055_v0  ;;  %v1747_v2 = vpop.f32.mrb[30].mxu0 }
 0x2c4   : > { %1149 = vst.msk [vmem:[%s2225_s30 + $0x70] sm:$0xff] %vm1134_vm1, %v1064_v62  ;;  %v1067_v3 = vadd.f32 %v1747_v2, %v2221_v39  ;;  %v1058_v4 = vpop.f32.mrb[31].mxu0 }
 0x2c5   : > { %1147 = vst.msk [vmem:[%s2225_s30 + $0x60] sm:$0xff] %vm1134_vm1, %v1056_v1  ;;  %v1059_v5 = vadd.f32 %v2221_v39, %v1058_v4 }
 0x2c6   : > { %1150 = vst.msk [vmem:[%s2225_s30 + $0x78] sm:$0xff] %vm1134_vm1, %v1067_v3 }
 0x2c7   : > { %1148 = vst.msk [vmem:[%s2225_s30 + $0x68] sm:$0xff] %vm1134_vm1, %v1059_v5 }
 0x2c9   : > { %v1750_v6 = vpop.f32.mrb[32].mxu0 }
 0x2ca   : > { %v1080_v7 = vadd.f32 %v1750_v6, %v2221_v39  ;;  %v1071_v8 = vpop.f32.mrb[33].mxu0 }
 0x2cb   : > { %v1072_v9 = vadd.f32 %v2221_v39, %v1071_v8  ;;  %v1751_v10 = vpop.f32.mrb[34].mxu0 }
 0x2cc   : > { %1153 = vst.msk [vmem:[%s2225_s30 + $0x90] sm:$0xff] %vm1134_vm1, %v1080_v7  ;;  %v1083_v11 = vadd.f32 %v1751_v10, %v2221_v39  ;;  %v1074_v12 = vpop.f32.mrb[35].mxu0 }
 0x2cd   : > { %1151 = vst.msk [vmem:[%s2225_s30 + $0x80] sm:$0xff] %vm1134_vm1, %v1072_v9  ;;  %v1075_v13 = vadd.f32 %v2221_v39, %v1074_v12 }
 0x2ce   : > { %1154 = vst.msk [vmem:[%s2225_s30 + $0x98] sm:$0xff] %vm1134_vm1, %v1083_v11 }
 0x2cf   : > { %1152 = vst.msk [vmem:[%s2225_s30 + $0x88] sm:$0xff] %vm1134_vm1, %v1075_v13 }
 0x2d1   : > { %v1754_v14 = vpop.f32.mrb[36].mxu0 }
 0x2d2   : > { %v1096_v15 = vadd.f32 %v1754_v14, %v2221_v39  ;;  %v1087_v16 = vpop.f32.mrb[37].mxu0 }
 0x2d3   : > { %v1088_v17 = vadd.f32 %v2221_v39, %v1087_v16  ;;  %v1755_v18 = vpop.f32.mrb[38].mxu0 }
 0x2d4   : > { %1157 = vst.msk [vmem:[%s2225_s30 + $0xb0] sm:$0xff] %vm1134_vm1, %v1096_v15  ;;  %v1099_v19 = vadd.f32 %v1755_v18, %v2221_v39  ;;  %v1090_v20 = vpop.f32.mrb[39].mxu0 }
 0x2d5   : > { %1155 = vst.msk [vmem:[%s2225_s30 + $0xa0] sm:$0xff] %vm1134_vm1, %v1088_v17  ;;  %v1091_v21 = vadd.f32 %v2221_v39, %v1090_v20 }
 0x2d6   : > { %1158 = vst.msk [vmem:[%s2225_s30 + $0xb8] sm:$0xff] %vm1134_vm1, %v1099_v19 }
 0x2d7   : > { %1156 = vst.msk [vmem:[%s2225_s30 + $0xa8] sm:$0xff] %vm1134_vm1, %v1091_v21 }
 0x2d9   : > { %v1758_v22 = vpop.f32.mrb[40].mxu0 }
 0x2da   : > { %v1112_v23 = vadd.f32 %v1758_v22, %v2221_v39  ;;  %v1103_v24 = vpop.f32.mrb[41].mxu0 }
 0x2db   : > { %v1104_v25 = vadd.f32 %v2221_v39, %v1103_v24  ;;  %v1759_v26 = vpop.f32.mrb[42].mxu0 }
 0x2dc   : > { %1161 = vst.msk [vmem:[%s2225_s30 + $0xd0] sm:$0xff] %vm1134_vm1, %v1112_v23  ;;  %v1115_v27 = vadd.f32 %v1759_v26, %v2221_v39  ;;  %v1106_v28 = vpop.f32.mrb[43].mxu0 }
 0x2dd   : > { %1159 = vst.msk [vmem:[%s2225_s30 + $0xc0] sm:$0xff] %vm1134_vm1, %v1104_v25  ;;  %v1107_v29 = vadd.f32 %v2221_v39, %v1106_v28 }
 0x2de   : > { %1162 = vst.msk [vmem:[%s2225_s30 + $0xd8] sm:$0xff] %vm1134_vm1, %v1115_v27 }
 0x2df   : > { %1160 = vst.msk [vmem:[%s2225_s30 + $0xc8] sm:$0xff] %vm1134_vm1, %v1107_v29 }
 0x2e1   : > { %v1762_v30 = vpop.f32.mrb[44].mxu0  ;;  %1173 = sbr.rel (!%p2024_p4) target bundleno = 800 (0x320), region = 52 }
 0x2e2   : > { %v1128_v31 = vadd.f32 %v1762_v30, %v2221_v39  ;;  %v1119_v32 = vpop.f32.mrb[45].mxu0 }
 0x2e3   : > { %v1120_v33 = vadd.f32 %v2221_v39, %v1119_v32  ;;  %v1763_v35 = vpop.f32.mrb[46].mxu0 }
 0x2e4   : > { %1165 = vst.msk [vmem:[%s2225_s30 + $0xf0] sm:$0xff] %vm1134_vm1, %v1128_v31  ;;  %v1131_v36 = vadd.f32 %v1763_v35, %v2221_v39  ;;  %v1122_v38 = vpop.f32.mrb[47].mxu0 }
 0x2e5   : > { %1163 = vst.msk [vmem:[%s2225_s30 + $0xe0] sm:$0xff] %vm1134_vm1, %v1120_v33  ;;  %v1123_v40 = vadd.f32 %v2221_v39, %v1122_v38 }
 0x2e6   : > { %1166 = vst.msk [vmem:[%s2225_s30 + $0xf8] sm:$0xff] %vm1134_vm1, %v1131_v36 }
 0x2e7   : > { %1164 = vst.msk [vmem:[%s2225_s30 + $0xe8] sm:$0xff] %vm1134_vm1, %v1123_v40 }
 0x2e8   : > { %s2478_s24 = smov (!%p1176_p8, %s1175_s24), 32 }
 0x2e9   : > { %s1551_s15 = sshll.u32 %s2478_s24, 7 }
 0x2ea   : > { %p1554_p9 = scmp.eq.s32.totalorder %s1551_s15, 0 }
 0x2eb   : > { %s2334_s16 = sshrl.u32 (!%p1554_p9), %s2478_s24, 5 }
 0x2ec   : > { %1184 = sbr.rel (%p1554_p9) target bundleno = 800 (0x320), region = 56  ;;  %p1555_p10 = scmp.le.s32.totalorder (!%p1554_p9), %s2334_s16, 0 }
 0x2f3   : > { %1462 = sbr.rel (%p1555_p10) target bundleno = 779 (0x30b), region = 132  ;;  %s2469_s27 = smov (!%p1555_p10), %s2328_s14 }
 0x2f4   : > { %s2470_s9 = smov (!%p1555_p10), %s2225_s30  ;;  %s2343_s12 = smov (!%p1555_p10), 0  }
 0x2f5   : > { %s2345_s17 = smov (!%p1555_p10), 0  }
 0x2fa LB: >> { %v1308_v39 = vld [vmem:[%s1933_s9] sm:$0xff]  ;;  %v1310_v41 = vld [vmem:[%s1933_s9 + $0x8] sm:$0xff]  ;;  %v1312_v34 = vld [vmem:[%s1933_s9 + $0x10] sm:$0xff]  ;;  %s1372_s18 = sadd.s32 1, %s1937_s12  ;;  %s1302_s17 = sadd.s32 1, %s1941_s17   ;;  %s1941_s17 = sphi %s2345_s17, %s1302_s17   ;;  %s1937_s12 = sphi %s2343_s12, %s2473_s12   ;;  %s1933_s9 = sphi %s2470_s9, %s2472_s9   ;;  %s1929_s27 = sphi %s2469_s27, %s2471_s27  }
 0x2fb   : >> { %1309 = vst [vmem:[%s1929_s27] sm:$0xff] %v1308_v39  ;;  %1311 = vst [vmem:[%s1929_s27 + $0x8] sm:$0xff] %v1310_v41  ;;  %v1314_v42 = vld [vmem:[%s1933_s9 + $0x18] sm:$0xff]  ;;  %v1316_v43 = vld [vmem:[%s1933_s9 + $0x20] sm:$0xff]  ;;  %p1373_p11 = scmp.ge.s32.totalorder %s1372_s18, %s2334_s16  ;;  %p1301_p12 = scmp.ge.s32.totalorder %s1302_s17, %s2334_s16 }
 0x2fc   : >> { %1313 = vst [vmem:[%s1929_s27 + $0x10] sm:$0xff] %v1312_v34  ;;  %v1318_v44 = vld [vmem:[%s1933_s9 + $0x28] sm:$0xff]  ;;  %1315 = vst [vmem:[%s1929_s27 + $0x18] sm:$0xff] %v1314_v42  ;;  %v1320_v45 = vld [vmem:[%s1933_s9 + $0x30] sm:$0xff] }
 0x2fd   : >> { %1317 = vst [vmem:[%s1929_s27 + $0x20] sm:$0xff] %v1316_v43  ;;  %1319 = vst [vmem:[%s1929_s27 + $0x28] sm:$0xff] %v1318_v44  ;;  %v1322_v46 = vld [vmem:[%s1933_s9 + $0x38] sm:$0xff]  ;;  %v1324_v47 = vld [vmem:[%s1933_s9 + $0x40] sm:$0xff]  ;;  %s2480_s18 = smov (%p1373_p11, %s1372_s18), 0 }
 0x2fe   : >> { %1321 = vst [vmem:[%s1929_s27 + $0x30] sm:$0xff] %v1320_v45  ;;  %1323 = vst [vmem:[%s1929_s27 + $0x38] sm:$0xff] %v1322_v46  ;;  %v1326_v48 = vld [vmem:[%s1933_s9 + $0x48] sm:$0xff]  ;;  %v1328_v49 = vld [vmem:[%s1933_s9 + $0x50] sm:$0xff]  ;;  %s1556_s19 = sshll.u32 %s2480_s18, 8  ;;  %s2473_s12 = smov %s2480_s18 }
 0x2ff   : >> { %1325 = vst [vmem:[%s1929_s27 + $0x40] sm:$0xff] %v1324_v47  ;;  %v1330_v50 = vld [vmem:[%s1933_s9 + $0x58] sm:$0xff]  ;;  %1327 = vst [vmem:[%s1929_s27 + $0x48] sm:$0xff] %v1326_v48  ;;  %v1332_v63 = vld [vmem:[%s1933_s9 + $0x60] sm:$0xff]  ;;  %s2401_s20 = scalar_lea.vmem %s2225_s30, %s1556_s19 [#allocation2]   ;;  %s1378_s21 = scalar_lea.vmem %s2328_s14, %s1556_s19  }
 0x300   : >> { %1329 = vst [vmem:[%s1929_s27 + $0x50] sm:$0xff] %v1328_v49  ;;  %1331 = vst [vmem:[%s1929_s27 + $0x58] sm:$0xff] %v1330_v50  ;;  %v1334_v37 = vld [vmem:[%s1933_s9 + $0x68] sm:$0xff]  ;;  %v1336_v51 = vld [vmem:[%s1933_s9 + $0x70] sm:$0xff] }
 0x301   : >> { %1333 = vst [vmem:[%s1929_s27 + $0x60] sm:$0xff] %v1332_v63  ;;  %1335 = vst [vmem:[%s1929_s27 + $0x68] sm:$0xff] %v1334_v37  ;;  %v1338_v52 = vld [vmem:[%s1933_s9 + $0x78] sm:$0xff]  ;;  %v1340_v53 = vld [vmem:[%s1933_s9 + $0x80] sm:$0xff] }
 0x302   : >> { %1337 = vst [vmem:[%s1929_s27 + $0x70] sm:$0xff] %v1336_v51  ;;  %v1342_v54 = vld [vmem:[%s1933_s9 + $0x88] sm:$0xff]  ;;  %1339 = vst [vmem:[%s1929_s27 + $0x78] sm:$0xff] %v1338_v52  ;;  %v1344_v55 = vld [vmem:[%s1933_s9 + $0x90] sm:$0xff] }
 0x303   : >> { %1341 = vst [vmem:[%s1929_s27 + $0x80] sm:$0xff] %v1340_v53  ;;  %1343 = vst [vmem:[%s1929_s27 + $0x88] sm:$0xff] %v1342_v54  ;;  %v1346_v56 = vld [vmem:[%s1933_s9 + $0x98] sm:$0xff]  ;;  %v1348_v57 = vld [vmem:[%s1933_s9 + $0xa0] sm:$0xff] }
 0x304   : >> { %1345 = vst [vmem:[%s1929_s27 + $0x90] sm:$0xff] %v1344_v55  ;;  %1347 = vst [vmem:[%s1929_s27 + $0x98] sm:$0xff] %v1346_v56  ;;  %v1350_v58 = vld [vmem:[%s1933_s9 + $0xa8] sm:$0xff]  ;;  %v1352_v59 = vld [vmem:[%s1933_s9 + $0xb0] sm:$0xff]  ;;  %1304 = sbr.rel (!%p1301_p12) target bundleno = 762 (0x2fa), region = 138 }
 0x305   : >> { %1349 = vst [vmem:[%s1929_s27 + $0xa0] sm:$0xff] %v1348_v57  ;;  %v1354_v60 = vld [vmem:[%s1933_s9 + $0xb8] sm:$0xff]  ;;  %1351 = vst [vmem:[%s1929_s27 + $0xa8] sm:$0xff] %v1350_v58  ;;  %v1356_v61 = vld [vmem:[%s1933_s9 + $0xc0] sm:$0xff] }
 0x306   : >> { %1353 = vst [vmem:[%s1929_s27 + $0xb0] sm:$0xff] %v1352_v59  ;;  %1355 = vst [vmem:[%s1929_s27 + $0xb8] sm:$0xff] %v1354_v60  ;;  %v1358_v62 = vld [vmem:[%s1933_s9 + $0xc8] sm:$0xff]  ;;  %v1360_v0 = vld [vmem:[%s1933_s9 + $0xd0] sm:$0xff] }
 0x307   : >> { %1357 = vst [vmem:[%s1929_s27 + $0xc0] sm:$0xff] %v1356_v61  ;;  %1359 = vst [vmem:[%s1929_s27 + $0xc8] sm:$0xff] %v1358_v62  ;;  %v1362_v1 = vld [vmem:[%s1933_s9 + $0xd8] sm:$0xff]  ;;  %v1364_v2 = vld [vmem:[%s1933_s9 + $0xe0] sm:$0xff] }
 0x308   : >> { %1361 = vst [vmem:[%s1929_s27 + $0xd0] sm:$0xff] %v1360_v0  ;;  %v1366_v3 = vld [vmem:[%s1933_s9 + $0xe8] sm:$0xff]  ;;  %1363 = vst [vmem:[%s1929_s27 + $0xd8] sm:$0xff] %v1362_v1  ;;  %v1368_v4 = vld [vmem:[%s1933_s9 + $0xf0] sm:$0xff] }
 0x309   : >> { %1365 = vst [vmem:[%s1929_s27 + $0xe0] sm:$0xff] %v1364_v2  ;;  %1367 = vst [vmem:[%s1929_s27 + $0xe8] sm:$0xff] %v1366_v3  ;;  %v1370_v5 = vld [vmem:[%s1933_s9 + $0xf8] sm:$0xff]  ;;  %s2472_s9 = smov %s2401_s20 }
 0x30a   : >> { %1369 = vst [vmem:[%s1929_s27 + $0xf0] sm:$0xff] %v1368_v4  ;;  %1371 = vst [vmem:[%s1929_s27 + $0xf8] sm:$0xff] %v1370_v5  ;;  %s2471_s27 = smov %s1378_s21 }
 0x30b PF: > { %s2442_s22 = sand.u32 31, %s2478_s24   ;;  %s1567_s23 = sshll.u32 %s2334_s16, 8 }
 0x30c   : > { %s1383_s26 = scalar_lea.vmem %s2225_s30, %s1567_s23 [#allocation2]   ;;  %s1385_s29 = scalar_lea.vmem %s2328_s14, %s1567_s23  }
 0x30d   : > { %p1561_p13 = scmp.le.s32.totalorder %s2442_s22, 0 }
 0x30e   : > { %s1943_s10 = smov (!%p1561_p13), %s1385_s29   ;;  %s1947_s11 = smov (!%p1561_p13), %s1383_s26  }
 0x30f   : > { %1476 = sbr.rel (%p1561_p13) target bundleno = 800 (0x320), region = 143  ;;  %s1951_s13 = smov (!%p1561_p13), 0  }
 0x310   : > { %s1955_s15 = smov (!%p1561_p13), 0  }
 0x316 LB: >> { %v1395_v6 = vld [vmem:[%s1949_s11] sm:$0xff]  ;;  %s1397_s24 = sadd.s32 1, %s1953_s13  ;;  %s1389_s15 = sadd.s32 1, %s1957_s15   ;;  %s1957_s15 = sphi %s1955_s15, %s1389_s15   ;;  %s1953_s13 = sphi %s1951_s13, %s1952_s13   ;;  %s1949_s11 = sphi %s1947_s11, %s1402_s11   ;;  %s1945_s10 = sphi %s1943_s10, %s1403_s10  }
 0x317   : >> { %1396 = vst [vmem:[%s1945_s10] sm:$0xff] %v1395_v6  ;;  %p1398_p0 = scmp.ge.s32.totalorder %s1397_s24, %s2442_s22  ;;  %p1388_p1 = scmp.ge.s32.totalorder %s1389_s15, %s2442_s22 }
 0x319   : >> { %s2482_s24 = smov (%p1398_p0, %s1397_s24), 0  ;;  %1391 = sbr.rel (!%p1388_p1) target bundleno = 790 (0x316), region = 149 }
 0x31a   : >> { %s1562_s30 = sshll.u32 %s2482_s24, 3  ;;  %s1952_s13 = smov %s2482_s24  }
 0x31b   : >> { %s1402_s11 = scalar_lea.vmem %s1383_s26, %s1562_s30 [#allocation2]   ;;  %s1403_s10 = scalar_lea.vmem %s1385_s29, %s1562_s30  }
 0x320 PF: > { %p14_p2 = scmp.ge.s32.totalorder %s2014_s28, 4   ;;  %s2474_s24 = smov %s1921_s25 }
 0x321   : > { %s2475_s25 = smov %s2022_s8  ;;  %s2476_s26 = smov %s2014_s28 }
 0x322   :  { %16 = sbr.rel (!%p14_p2) target bundleno = 2 (0x2), region = 160 }

// kernel: tpu_custom_call.1
= control target key start
LH: loop header
LB: loop body
LE: loop exit
PB: predicated region body
PF: predicated region fallthrough
CT: control target
= control target key end

     0   :  { %s1999_s24 = smov 0   ;;  %s2001_s25 = smov 0   ;;  %s2460_s0 = inlined_call_operand.vmem [shape: f32[500,16], index: 0, kind: input, shape index: {}]   ;;  %s2461_s1 = inlined_call_operand.vmem [shape: bf16[16,128], index: 1, kind: input, shape index: {}]   ;;  %s2462_s2 = inlined_call_operand.vmem [shape: f32[1,128], index: 2, kind: input, shape index: {}]   ;;  %s2463_s3 = inlined_call_operand.vmem [shape: bf16[128,128], index: 3, kind: input, shape index: {}]   ;;  %s2464_s4 = inlined_call_operand.vmem [shape: f32[1,128], index: 4, kind: input, shape index: {}]   ;;  %s2465_s5 = inlined_call_operand.vmem [shape: bf16[128,8], index: 5, kind: input, shape index: {}]   ;;  %s2466_s6 = inlined_call_operand.vmem [shape: f32[1,8], index: 6, kind: input, shape index: {}]   ;;  %s2467_s7 = inlined_call_operand.vmem [shape: f32[500,8], index: 7, kind: output, shape index: {}]  }
   0x1   :  { %s2003_s26 = smov 0  }
   0x2 LB: > { %s2012_s27 = sadd.s32 4294967295, %s1925_s26   ;;  %s2014_s28 = sadd.s32 1, %s1925_s26   ;;  %s1925_s26 = sphi %s2003_s26, %s2476_s26   ;;  %s1921_s25 = sphi %s2001_s25, %s2475_s25   ;;  %s1917_s24 = sphi %s1999_s24, %s2474_s24  }
   0x3   : > { %s173_s29 = ssub.s32 %s1925_s26, %s2014_s28  ;;  %s176_s30 = sadd.s32 1, %s1921_s25 }
   0x4   : > { %p174_p0 = scmp.eq.s32.totalorder %s173_s29, 0  ;;  %p186_p1 = scmp.ne.s32.totalorder %s1921_s25, %s1917_s24 }
   0x5   : > { %p187_p2 = scmp.eq.s32.totalorder %s2012_s27, 1  ;;  %p1509_p3 = scmp.ge.s32.totalorder %s1925_s26, 1 }
   0x6   : > { %s2022_s8 = scalar_select %p174_p0, %s1921_s25, %s176_s30  }
   0x7   : > { %p2024_p4 = por %p187_p2, %p186_p1  ;;  %p246_p5 = scmp.lt.s32.totalorder %s1925_s26, 3 }
   0x9   : > { %p247_p6 = pnand %p1509_p3, %p246_p5 }
   0xa   : > { %v1854_v0 = vld [vmem:[%s2461_s1] sm:$0xff] (!%p247_p6)   ;;  %s2032_s12 = sshll.u32 (!%p247_p6), %s2012_s27, 5  ;;  %vm364_vm0 = vcmask (!%p247_p6), 130048   ;;  %v1856_v23 = vld [vmem:[%s2463_s3 + $0x8] sm:$0xff] (!%p247_p6)   ;;  %v1857_v28 = vld [vmem:[%s2463_s3 + $0x10] sm:$0xff] (!%p247_p6)   ;;  %s278_s22 = sand.u32 (!%p247_p6), 1, %s1917_s24  }
   0xb   : > { %250 = sbr.rel (%p247_p6) target bundleno = 800 (0x320), region = 48  ;;  %p286_p7 = scmp.lt.s32.totalorder (!%p247_p6), %s2032_s12, 62  ;;  %1634 = vmatprep.subr.bf16.mxu0 (!%p247_p6), %v1854_v0  ;;  %1764 = vmatprep.subr.bf16.mxu1 (!%p247_p6), %v1854_v0  ;;  %v1855_v1 = vld [vmem:[%s2463_s3] sm:$0xff] (!%p247_p6)   ;;  %v1858_v37 = vld [vmem:[%s2463_s3 + $0x18] sm:$0xff] (!%p247_p6)   ;;  %v1860_v50 = vld [vmem:[%s2463_s3 + $0x28] sm:$0xff] (!%p247_p6)   ;;  %vm1134_vm1 = vcmask (!%p247_p6), 64512  }
   0xc   : > { %1635 = vmatpush3.bf16.msra.mxu0 (!%p247_p6), %v1854_v0  ;;  %1765 = vmatpush3.bf16.msra.mxu1 (!%p247_p6), %v1854_v0  ;;  %v1859_v45 = vld [vmem:[%s2463_s3 + $0x20] sm:$0xff] (!%p247_p6)   ;;  %v1861_v55 = vld [vmem:[%s2463_s3 + $0x30] sm:$0xff] (!%p247_p6)   ;;  %v1862_v56 = vld [vmem:[%s2463_s3 + $0x38] sm:$0xff] (!%p247_p6)   ;;  %s1510_s23 = sshll.u32 (!%p247_p6), %s278_s22, 8 }
   0xd   : > { %1668 = vmatprep.subr.bf16.mxu1 (!%p247_p6), %v1855_v1  ;;  %v1863_v57 = vld [vmem:[%s2465_s5] sm:$0xff] (!%p247_p6)   ;;  %v1864_v58 = vld [vmem:[%s2465_s5 + $0x8] sm:$0xff] (!%p247_p6)   ;;  %v1865_v59 = vld [vmem:[%s2465_s5 + $0x10] sm:$0xff] (!%p247_p6)   ;;  %s2225_s30 = scalar_lea.vmem (!%p247_p6), [#allocation2], %s1510_s23  }
   0xe   : > { %1716 = vmatprep.subr.bf16.mxu0 (!%p247_p6), %v1863_v57  ;;  %v1866_v60 = vld [vmem:[%s2465_s5 + $0x18] sm:$0xff] (!%p247_p6)   ;;  %v1867_v61 = vld [vmem:[%s2465_s5 + $0x20] sm:$0xff] (!%p247_p6)   ;;  %v1868_v62 = vld [vmem:[%s2465_s5 + $0x28] sm:$0xff] (!%p247_p6)  }
   0xf   : > { %v2134_v63 = vld [vmem:[%s2462_s2] ss:$0 sm:$0xff] (!%p247_p6) }
  0x12   : > { %s287_s15 = scalar_select %p286_p7, %s2032_s12, 62 }
  0x13   : > { %s1175_s24 = ssub.s32 (%p2024_p4), 63, %s2032_s12  ;;  %s1566_s10 = sshll.u32 (%p2024_p4), %s2012_s27, 8 }
  0x14   : > { %s1512_s16 = sshll.u32 %s287_s15, 3  ;;  %p1176_p8 = scmp.lt.s32.totalorder (%p2024_p4), %s1175_s24, 32 }
  0x15   : > { %s2042_s19 = scalar_lea.vmem %s2460_s0, %s1512_s16  ;;  %s2328_s14 = scalar_lea.vmem (%p2024_p4), %s2467_s7, %s1566_s10  }
  0x16   : > { %v301_v2 = vld [vmem:[%s2042_s19] sm:$0xff]  ;;  %v302_v3 = vld [vmem:[%s2042_s19 + $0x8] sm:$0xff]  ;;  %v303_v4 = vld [vmem:[%s2042_s19 + $0x10] sm:$0xff] }
  0x17   : > { %v333_v5 = vpack.c.bf16 %v302_v3, %v301_v2  ;;  %v304_v6 = vld [vmem:[%s2042_s19 + $0x18] sm:$0xff]  ;;  %v305_v7 = vld [vmem:[%s2042_s19 + $0x20] sm:$0xff]  ;;  %v306_v8 = vld [vmem:[%s2042_s19 + $0x28] sm:$0xff] }
  0x18   : > { %v334_v9 = vpack.c.bf16 %v304_v6, %v303_v4  ;;  %v335_v10 = vpack.c.bf16 %v306_v8, %v305_v7  ;;  %v307_v11 = vld [vmem:[%s2042_s19 + $0x30] sm:$0xff]  ;;  %v308_v12 = vld [vmem:[%s2042_s19 + $0x38] sm:$0xff]  ;;  %v309_v13 = vld [vmem:[%s2042_s19 + $0x40] sm:$0xff] }
  0x19   : > { %1636 = vmatprep.mubr.msk.bf16.mxu0 %vm364_vm0, %v333_v5  ;;  %v310_v14 = vld [vmem:[%s2042_s19 + $0x48] sm:$0xff]  ;;  %v317_v15 = vld [vmem:[%s2042_s19 + $0x80] sm:$0xff]  ;;  %v319_v18 = vld [vmem:[%s2042_s19 + $0x90] sm:$0xff]  ;;  %v336_v24 = vpack.c.bf16 %v308_v12, %v307_v11 }
  0x1a   : > { %1637 = vmatmul.mubr.msk.bf16.vlgmr.msra.gmra.mrb[0].mxu0 %vm364_vm0, %v334_v9  ;;  %v318_v16 = vld [vmem:[%s2042_s19 + $0x88] sm:$0xff]  ;;  %v320_v19 = vld [vmem:[%s2042_s19 + $0x98] sm:$0xff]  ;;  %v321_v20 = vld [vmem:[%s2042_s19 + $0xa0] sm:$0xff]  ;;  %v337_v26 = vpack.c.bf16 %v310_v14, %v309_v13 }
  0x1b   : > { %1640 = vmatprep.mubr.msk.bf16.mxu0 %vm364_vm0, %v335_v10  ;;  %v341_v17 = vpack.c.bf16 %v318_v16, %v317_v15  ;;  %v342_v21 = vpack.c.bf16 %v320_v19, %v319_v18  ;;  %v322_v22 = vld [vmem:[%s2042_s19 + $0xa8] sm:$0xff]  ;;  %v323_v27 = vld [vmem:[%s2042_s19 + $0xb0] sm:$0xff]  ;;  %v324_v29 = vld [vmem:[%s2042_s19 + $0xb8] sm:$0xff]  ;;  %1717 = vmatpush3.bf16.msra.mxu0 %v1863_v57 }
  0x1c   : > { %v343_v25 = vpack.c.bf16 %v322_v22, %v321_v20  ;;  %v325_v30 = vld [vmem:[%s2042_s19 + $0xc0] sm:$0xff]  ;;  %v326_v31 = vld [vmem:[%s2042_s19 + $0xc8] sm:$0xff]  ;;  %v311_v32 = vld [vmem:[%s2042_s19 + $0x50] sm:$0xff]  ;;  %v344_v36 = vpack.c.bf16 %v324_v29, %v323_v27  ;;  %1718 = vmatprep.subr.bf16.mxu0 %v1864_v58 }
  0x1d   : > { %1652 = vmatprep.mubr.msk.bf16.mxu1 %vm364_vm0, %v341_v17  ;;  %v312_v33 = vld [vmem:[%s2042_s19 + $0x58] sm:$0xff]  ;;  %v313_v34 = vld [vmem:[%s2042_s19 + $0x60] sm:$0xff]  ;;  %v314_v35 = vld [vmem:[%s2042_s19 + $0x68] sm:$0xff]  ;;  %v345_v38 = vpack.c.bf16 %v326_v31, %v325_v30 }
  0x1e   : > { %1653 = vmatmul.mubr.msk.bf16.vlgmr.msra.gmra.mrb[0].mxu1 %vm364_vm0, %v342_v21  ;;  %v338_v39 = vpack.c.bf16 %v312_v33, %v311_v32  ;;  %v339_v40 = vpack.c.bf16 %v314_v35, %v313_v34  ;;  %v327_v41 = vld [vmem:[%s2042_s19 + $0xd0] sm:$0xff]  ;;  %v328_v42 = vld [vmem:[%s2042_s19 + $0xd8] sm:$0xff]  ;;  %v329_v43 = vld [vmem:[%s2042_s19 + $0xe0] sm:$0xff] }
  0x1f   : > { %1656 = vmatprep.mubr.msk.bf16.mxu1 %vm364_vm0, %v343_v25  ;;  %1669 = vmatpush3.bf16.msra.mxu1 %v1855_v1  ;;  %v330_v44 = vld [vmem:[%s2042_s19 + $0xe8] sm:$0xff]  ;;  %v315_v46 = vld [vmem:[%s2042_s19 + $0x70] sm:$0xff]  ;;  %v316_v47 = vld [vmem:[%s2042_s19 + $0x78] sm:$0xff]  ;;  %v346_v48 = vpack.c.bf16 %v328_v42, %v327_v41 }
  0x20   : > { %1670 = vmatprep.subr.bf16.mxu1 %v1856_v23  ;;  %v347_v49 = vpack.c.bf16 %v330_v44, %v329_v43  ;;  %v340_v51 = vpack.c.bf16 %v316_v47, %v315_v46  ;;  %v331_v52 = vld [vmem:[%s2042_s19 + $0xf0] sm:$0xff]  ;;  %v332_v53 = vld [vmem:[%s2042_s19 + $0xf8] sm:$0xff]  ;;  %1719 = vmatpush3.bf16.msra.mxu0 %v1864_v58 }
  0x21   : > { %v348_v54 = vpack.c.bf16 %v332_v53, %v331_v52  ;;  %1720 = vmatprep.subr.bf16.mxu0 %v1865_v59 }
  0x22   : > { %1641 = vmatmul.mubr.msk.bf16.gmra.mrb[4].mxu0 %vm364_vm0, %v336_v24 }
  0x23   : > { %1644 = vmatprep.mubr.msk.bf16.mxu0 %vm364_vm0, %v337_v26  ;;  %1671 = vmatpush3.bf16.msra.mxu1 %v1856_v23 }
  0x24   : > { %1672 = vmatprep.subr.bf16.mxu1 %v1857_v28  ;;  %1721 = vmatpush3.bf16.msra.mxu0 %v1865_v59 }
  0x25   : > { %1722 = vmatprep.subr.bf16.mxu0 %v1866_v60 }
  0x26   : > { %1657 = vmatmul.mubr.msk.bf16.gmra.mrb[4].mxu1 %vm364_vm0, %v344_v36 }
  0x27   : > { %1660 = vmatprep.mubr.msk.bf16.mxu1 %vm364_vm0, %v345_v38  ;;  %1673 = vmatpush3.bf16.msra.mxu1 %v1857_v28 }
  0x28   : > { %1674 = vmatprep.subr.bf16.mxu1 %v1858_v37  ;;  %1723 = vmatpush3.bf16.msra.mxu0 %v1866_v60 }
  0x29   : > { %1724 = vmatprep.subr.bf16.mxu0 %v1867_v61 }
  0x2a   : > { %1645 = vmatmul.mubr.msk.bf16.gmra.mrb[8].mxu0 %vm364_vm0, %v338_v39 }
  0x2b   : > { %1648 = vmatprep.mubr.msk.bf16.mxu0 %vm364_vm0, %v339_v40  ;;  %1675 = vmatpush3.bf16.msra.mxu1 %v1858_v37 }
  0x2c   : > { %1676 = vmatprep.subr.bf16.mxu1 %v1859_v45  ;;  %1725 = vmatpush3.bf16.msra.mxu0 %v1867_v61 }
  0x2d   : > { %1726 = vmatprep.subr.bf16.mxu0 %v1868_v62 }
  0x2e   : > { %1661 = vmatmul.mubr.msk.bf16.gmra.mrb[8].mxu1 %vm364_vm0, %v346_v48 }
  0x2f   : > { %1664 = vmatprep.mubr.msk.bf16.mxu1 %vm364_vm0, %v347_v49  ;;  %1677 = vmatpush3.bf16.msra.mxu1 %v1859_v45 }
  0x30   : > { %1678 = vmatprep.subr.bf16.mxu1 %v1860_v50  ;;  %1727 = vmatpush3.bf16.msra.mxu0 %v1868_v62 }
  0x32   : > { %1649 = vmatmul.mubr.msk.bf16.gmra.mrb[12].mxu0 %vm364_vm0, %v340_v51 }
  0x33   : > { %1679 = vmatpush3.bf16.msra.mxu1 %v1860_v50 }
  0x34   : > { %1680 = vmatprep.subr.bf16.mxu1 %v1861_v55 }
  0x36   : > { %1665 = vmatmul.mubr.msk.bf16.gmra.mrb[12].mxu1 %vm364_vm0, %v348_v54 }
  0x37   : > { %1681 = vmatpush3.bf16.msra.mxu1 %v1861_v55 }
  0x38   : > { %1682 = vmatprep.subr.bf16.mxu1 %v1862_v56 }
  0x3b   : > { %1683 = vmatpush3.bf16.msra.mxu1 %v1862_v56 }
  0xed   : > { %v1638_v0 = vpop.f32.mrb[0].mxu0 }
  0xee   : > { %v456_v1 = vadd.f32 %v1638_v0, %v2134_v63  ;;  %v447_v2 = vpop.f32.mrb[1].mxu0 }
  0xef   : > { %v448_v3 = vadd.f32 %v2134_v63, %v447_v2  ;;  %v1639_v4 = vpop.f32.mrb[2].mxu0 }
  0xf0   : > { %v459_v5 = vadd.f32 %v1639_v4, %v2134_v63  ;;  %v450_v6 = vpop.f32.mrb[3].mxu0  ;;  %v576_v8 = vmax.f32 %v456_v1, 0.0 }
  0xf1   : > { %v451_v7 = vadd.f32 %v2134_v63, %v450_v6  ;;  %v1654_v10 = vpop.f32.mrb[0].mxu1  ;;  %v574_v11 = vmax.f32 %v448_v3, 0.0 }
  0xf2   : > { %v577_v9 = vmax.f32 %v459_v5, 0.0  ;;  %v520_v13 = vadd.f32 %v1654_v10, %v2134_v63  ;;  %v511_v14 = vpop.f32.mrb[1].mxu1 }
  0xf3   : > { %v575_v12 = vmax.f32 %v451_v7, 0.0  ;;  %v512_v16 = vadd.f32 %v2134_v63, %v511_v14  ;;  %v1655_v17 = vpop.f32.mrb[2].mxu1 }
  0xf4   : > { %v607_v15 = vpack.c.bf16 %v577_v9, %v576_v8  ;;  %v592_v20 = vmax.f32 %v520_v13, 0.0  ;;  %v523_v21 = vadd.f32 %v1655_v17, %v2134_v63  ;;  %v514_v22 = vpop.f32.mrb[3].mxu1 }
  0xf5   : > { %v606_v18 = vpack.c.bf16 %v575_v12, %v574_v11  ;;  %v1642_v19 = vpop.f32.mrb[4].mxu0  ;;  %v590_v25 = vmax.f32 %v512_v16, 0.0  ;;  %v515_v26 = vadd.f32 %v2134_v63, %v514_v22 }
  0xf6   : > { %v472_v23 = vadd.f32 %v1642_v19, %v2134_v63  ;;  %v463_v24 = vpop.f32.mrb[5].mxu0  ;;  %v593_v29 = vmax.f32 %v523_v21, 0.0 }
  0xf7   : > { %v464_v27 = vadd.f32 %v2134_v63, %v463_v24  ;;  %v1643_v28 = vpop.f32.mrb[6].mxu0  ;;  %1684 = vmatprep.mubr.bf16.mxu1 %v606_v18  ;;  %v591_v32 = vmax.f32 %v515_v26, 0.0 }
  0xf8   : > { %v475_v30 = vadd.f32 %v1643_v28, %v2134_v63  ;;  %v466_v31 = vpop.f32.mrb[7].mxu0  ;;  %1685 = vmatmul.mubr.bf16.vlgmr.msra.gmra.mrb[16].mxu1 %v607_v15  ;;  %v2148_v34 = vpack.c.bf16 %v593_v29, %v592_v20  ;;  %v580_v35 = vmax.f32 %v472_v23, 0.0 }
  0xf9   : > { %v467_v33 = vadd.f32 %v2134_v63, %v466_v31  ;;  %v2150_v37 = vpack.c.bf16 %v591_v32, %v590_v25  ;;  %v1658_v38 = vpop.f32.mrb[4].mxu1  ;;  %v578_v39 = vmax.f32 %v464_v27, 0.0 }
  0xfa   : > { %v581_v36 = vmax.f32 %v475_v30, 0.0  ;;  %v536_v41 = vadd.f32 %v1658_v38, %v2134_v63  ;;  %v527_v42 = vpop.f32.mrb[5].mxu1 }
  0xfb   : > { %v579_v40 = vmax.f32 %v467_v33, 0.0  ;;  %v528_v44 = vadd.f32 %v2134_v63, %v527_v42  ;;  %v1659_v45 = vpop.f32.mrb[6].mxu1 }
  0xfc   : > { %v609_v43 = vpack.c.bf16 %v581_v36, %v580_v35  ;;  %v596_v48 = vmax.f32 %v536_v41, 0.0  ;;  %v539_v49 = vadd.f32 %v1659_v45, %v2134_v63  ;;  %v530_v50 = vpop.f32.mrb[7].mxu1 }
  0xfd   : > { %v608_v46 = vpack.c.bf16 %v579_v40, %v578_v39  ;;  %v1646_v47 = vpop.f32.mrb[8].mxu0  ;;  %v594_v53 = vmax.f32 %v528_v44, 0.0  ;;  %v531_v54 = vadd.f32 %v2134_v63, %v530_v50 }
  0xfe   : > { %v488_v51 = vadd.f32 %v1646_v47, %v2134_v63  ;;  %v479_v52 = vpop.f32.mrb[9].mxu0  ;;  %v597_v57 = vmax.f32 %v539_v49, 0.0 }
  0xff   : > { %v480_v55 = vadd.f32 %v2134_v63, %v479_v52  ;;  %v1647_v56 = vpop.f32.mrb[10].mxu0  ;;  %1688 = vmatprep.mubr.bf16.mxu1 %v608_v46  ;;  %v595_v60 = vmax.f32 %v531_v54, 0.0 }
 0x100   : > { %v491_v58 = vadd.f32 %v1647_v56, %v2134_v63  ;;  %v482_v59 = vpop.f32.mrb[11].mxu0  ;;  %1689 = vmatmul.mubr.bf16.gmra.mrb[20].mxu1 %v609_v43  ;;  %v617_v62 = vpack.c.bf16 %v597_v57, %v596_v48  ;;  %v584_v0 = vmax.f32 %v488_v51, 0.0 }
 0x101   : > { %v483_v61 = vadd.f32 %v2134_v63, %v482_v59  ;;  %v616_v2 = vpack.c.bf16 %v595_v60, %v594_v53  ;;  %v1662_v3 = vpop.f32.mrb[8].mxu1  ;;  %v582_v4 = vmax.f32 %v480_v55, 0.0 }
 0x102   : > { %v585_v1 = vmax.f32 %v491_v58, 0.0  ;;  %v552_v6 = vadd.f32 %v1662_v3, %v2134_v63  ;;  %v543_v7 = vpop.f32.mrb[9].mxu1 }
 0x103   : > { %v583_v5 = vmax.f32 %v483_v61, 0.0  ;;  %v544_v9 = vadd.f32 %v2134_v63, %v543_v7  ;;  %v1663_v10 = vpop.f32.mrb[10].mxu1 }
 0x104   : > { %v611_v8 = vpack.c.bf16 %v585_v1, %v584_v0  ;;  %v600_v13 = vmax.f32 %v552_v6, 0.0  ;;  %v555_v14 = vadd.f32 %v1663_v10, %v2134_v63  ;;  %v546_v15 = vpop.f32.mrb[11].mxu1 }
 0x105   : > { %v610_v11 = vpack.c.bf16 %v583_v5, %v582_v4  ;;  %v1650_v12 = vpop.f32.mrb[12].mxu0  ;;  %v598_v18 = vmax.f32 %v544_v9, 0.0  ;;  %v547_v19 = vadd.f32 %v2134_v63, %v546_v15 }
 0x106   : > { %v504_v16 = vadd.f32 %v1650_v12, %v2134_v63  ;;  %v495_v17 = vpop.f32.mrb[13].mxu0  ;;  %v601_v22 = vmax.f32 %v555_v14, 0.0 }
 0x107   : > { %v496_v20 = vadd.f32 %v2134_v63, %v495_v17  ;;  %v1651_v21 = vpop.f32.mrb[14].mxu0  ;;  %1692 = vmatprep.mubr.bf16.mxu1 %v610_v11  ;;  %v599_v25 = vmax.f32 %v547_v19, 0.0 }
 0x108   : > { %v507_v23 = vadd.f32 %v1651_v21, %v2134_v63  ;;  %v498_v24 = vpop.f32.mrb[15].mxu0  ;;  %1693 = vmatmul.mubr.bf16.gmra.mrb[24].mxu1 %v611_v8  ;;  %v619_v27 = vpack.c.bf16 %v601_v22, %v600_v13  ;;  %v588_v28 = vmax.f32 %v504_v16, 0.0 }
 0x109   : > { %v499_v26 = vadd.f32 %v2134_v63, %v498_v24  ;;  %v618_v30 = vpack.c.bf16 %v599_v25, %v598_v18  ;;  %v1666_v31 = vpop.f32.mrb[12].mxu1  ;;  %v586_v32 = vmax.f32 %v496_v20, 0.0 }
 0x10a   : > { %v589_v29 = vmax.f32 %v507_v23, 0.0  ;;  %v568_v35 = vadd.f32 %v1666_v31, %v2134_v63  ;;  %v559_v36 = vpop.f32.mrb[13].mxu1 }
 0x10b   : > { %v587_v33 = vmax.f32 %v499_v26, 0.0  ;;  %v560_v39 = vadd.f32 %v2134_v63, %v559_v36  ;;  %v1667_v40 = vpop.f32.mrb[14].mxu1 }
 0x10c   : > { %v613_v38 = vpack.c.bf16 %v589_v29, %v588_v28  ;;  %v604_v42 = vmax.f32 %v568_v35, 0.0  ;;  %v571_v43 = vadd.f32 %v1667_v40, %v2134_v63  ;;  %v562_v44 = vpop.f32.mrb[15].mxu1 }
 0x10d   : > { %v612_v41 = vpack.c.bf16 %v587_v33, %v586_v32  ;;  %v602_v45 = vmax.f32 %v560_v39, 0.0  ;;  %v563_v46 = vadd.f32 %v2134_v63, %v562_v44  ;;  %v1869_v63 = vld [vmem:[%s2465_s5 + $0x30] sm:$0xff]  }
 0x10e   : > { %v605_v47 = vmax.f32 %v571_v43, 0.0  ;;  %1728 = vmatprep.subr.bf16.mxu0 %v1869_v63 }
 0x10f   : > { %1696 = vmatprep.mubr.bf16.mxu1 %v612_v41  ;;  %v603_v48 = vmax.f32 %v563_v46, 0.0  ;;  %1729 = vmatpush3.bf16.msra.mxu0 %v1869_v63 }
 0x110   : > { %1697 = vmatmul.mubr.bf16.gmra.mrb[28].mxu1 %v613_v38  ;;  %v621_v49 = vpack.c.bf16 %v605_v47, %v604_v42 }
 0x111   : > { %1700 = vmatprep.mubr.bf16.mxu1 %v2150_v37  ;;  %v620_v50 = vpack.c.bf16 %v603_v48, %v602_v45  ;;  %v1870_v37 = vld [vmem:[%s2465_s5 + $0x38] sm:$0xff]  }
 0x112   : > { %1730 = vmatprep.subr.bf16.mxu0 %v1870_v37 }
 0x113   : > { %1731 = vmatpush3.bf16.msra.mxu0 %v1870_v37 }
 0x118   : > { %1701 = vmatmul.mubr.bf16.gmra.mrb[32].mxu1 %v2148_v34  ;;  %v2183_v34 = vld [vmem:[%s2464_s4] ss:$0 sm:$0xff] }
 0x119   : > { %1704 = vmatprep.mubr.bf16.mxu1 %v616_v2 }
 0x120   : > { %1705 = vmatmul.mubr.bf16.gmra.mrb[36].mxu1 %v617_v62 }
 0x121   : > { %1708 = vmatprep.mubr.bf16.mxu1 %v618_v30 }
 0x128   : > { %1709 = vmatmul.mubr.bf16.gmra.mrb[40].mxu1 %v619_v27 }
 0x129   : > { %1712 = vmatprep.mubr.bf16.mxu1 %v620_v50 }
 0x130   : > { %1713 = vmatmul.mubr.bf16.gmra.mrb[44].mxu1 %v621_v49 }
 0x1cb   : > { %v1686_v51 = vpop.f32.mrb[16].mxu1 }
 0x1cc   : > { %v736_v52 = vadd.f32 %v1686_v51, %v2183_v34  ;;  %v727_v53 = vpop.f32.mrb[17].mxu1 }
 0x1cd   : > { %v728_v54 = vadd.f32 %v2183_v34, %v727_v53  ;;  %v1687_v55 = vpop.f32.mrb[18].mxu1 }
 0x1ce   : > { %v739_v56 = vadd.f32 %v1687_v55, %v2183_v34  ;;  %v730_v57 = vpop.f32.mrb[19].mxu1  ;;  %v856_v59 = vmax.f32 %v736_v52, 0.0 }
 0x1cf   : > { %v731_v58 = vadd.f32 %v2183_v34, %v730_v57  ;;  %v854_v61 = vmax.f32 %v728_v54, 0.0 }
 0x1d0   : > { %v857_v60 = vmax.f32 %v739_v56, 0.0 }
 0x1d1   : > { %v855_v62 = vmax.f32 %v731_v58, 0.0 }
 0x1d2   : > { %v887_v0 = vpack.c.bf16 %v857_v60, %v856_v59 }
 0x1d3   : > { %v886_v1 = vpack.c.bf16 %v855_v62, %v854_v61  ;;  %v1690_v2 = vpop.f32.mrb[20].mxu1 }
 0x1d4   : > { %v752_v3 = vadd.f32 %v1690_v2, %v2183_v34  ;;  %v743_v4 = vpop.f32.mrb[21].mxu1 }
 0x1d5   : > { %v744_v5 = vadd.f32 %v2183_v34, %v743_v4  ;;  %v1691_v6 = vpop.f32.mrb[22].mxu1  ;;  %1732 = vmatprep.mubr.bf16.mxu0 %v886_v1 }
 0x1d6   : > { %v755_v7 = vadd.f32 %v1691_v6, %v2183_v34  ;;  %v746_v8 = vpop.f32.mrb[23].mxu1  ;;  %1733 = vmatmul.mubr.bf16.vlgmr.msra.gmra.mrb[16].mxu0 %v887_v0  ;;  %v860_v10 = vmax.f32 %v752_v3, 0.0 }
 0x1d7   : > { %v747_v9 = vadd.f32 %v2183_v34, %v746_v8  ;;  %v858_v12 = vmax.f32 %v744_v5, 0.0 }
 0x1d8   : > { %v861_v11 = vmax.f32 %v755_v7, 0.0 }
 0x1d9   : > { %v859_v13 = vmax.f32 %v747_v9, 0.0 }
 0x1da   : > { %v889_v14 = vpack.c.bf16 %v861_v11, %v860_v10 }
 0x1db   : > { %v888_v15 = vpack.c.bf16 %v859_v13, %v858_v12  ;;  %v1694_v16 = vpop.f32.mrb[24].mxu1 }
 0x1dc   : > { %v768_v17 = vadd.f32 %v1694_v16, %v2183_v34  ;;  %v759_v18 = vpop.f32.mrb[25].mxu1 }
 0x1dd   : > { %v760_v19 = vadd.f32 %v2183_v34, %v759_v18  ;;  %v1695_v20 = vpop.f32.mrb[26].mxu1  ;;  %1736 = vmatprep.mubr.bf16.mxu0 %v888_v15 }
 0x1de   : > { %v771_v21 = vadd.f32 %v1695_v20, %v2183_v34  ;;  %v762_v22 = vpop.f32.mrb[27].mxu1  ;;  %1737 = vmatmul.mubr.bf16.gmra.mrb[20].mxu0 %v889_v14  ;;  %v864_v24 = vmax.f32 %v768_v17, 0.0 }
 0x1df   : > { %v763_v23 = vadd.f32 %v2183_v34, %v762_v22  ;;  %v862_v26 = vmax.f32 %v760_v19, 0.0 }
 0x1e0   : > { %v865_v25 = vmax.f32 %v771_v21, 0.0 }
 0x1e1   : > { %v863_v27 = vmax.f32 %v763_v23, 0.0 }
 0x1e2   : > { %v891_v28 = vpack.c.bf16 %v865_v25, %v864_v24 }
 0x1e3   : > { %v890_v29 = vpack.c.bf16 %v863_v27, %v862_v26  ;;  %v1698_v30 = vpop.f32.mrb[28].mxu1 }
 0x1e4   : > { %v784_v31 = vadd.f32 %v1698_v30, %v2183_v34  ;;  %v775_v32 = vpop.f32.mrb[29].mxu1 }
 0x1e5   : > { %v776_v33 = vadd.f32 %v2183_v34, %v775_v32  ;;  %v1699_v35 = vpop.f32.mrb[30].mxu1  ;;  %1740 = vmatprep.mubr.bf16.mxu0 %v890_v29 }
 0x1e6   : > { %v787_v36 = vadd.f32 %v1699_v35, %v2183_v34  ;;  %v778_v38 = vpop.f32.mrb[31].mxu1  ;;  %1741 = vmatmul.mubr.bf16.gmra.mrb[24].mxu0 %v891_v28  ;;  %v868_v40 = vmax.f32 %v784_v31, 0.0 }
 0x1e7   : > { %v779_v39 = vadd.f32 %v2183_v34, %v778_v38  ;;  %v866_v42 = vmax.f32 %v776_v33, 0.0 }
 0x1e8   : > { %v869_v41 = vmax.f32 %v787_v36, 0.0 }
 0x1e9   : > { %v867_v43 = vmax.f32 %v779_v39, 0.0  ;;  %v2221_v39 = vld [vmem:[%s2466_s6] ss:$0 sm:$0xff] }
 0x1ea   : > { %v893_v44 = vpack.c.bf16 %v869_v41, %v868_v40 }
 0x1eb   : > { %v892_v45 = vpack.c.bf16 %v867_v43, %v866_v42  ;;  %v1702_v46 = vpop.f32.mrb[32].mxu1 }
 0x1ec   : > { %v800_v47 = vadd.f32 %v1702_v46, %v2183_v34  ;;  %v791_v48 = vpop.f32.mrb[33].mxu1 }
 0x1ed   : > { %v792_v49 = vadd.f32 %v2183_v34, %v791_v48  ;;  %v1703_v50 = vpop.f32.mrb[34].mxu1  ;;  %1744 = vmatprep.mubr.bf16.mxu0 %v892_v45 }
 0x1ee   : > { %v803_v63 = vadd.f32 %v1703_v50, %v2183_v34  ;;  %v794_v37 = vpop.f32.mrb[35].mxu1  ;;  %1745 = vmatmul.mubr.bf16.gmra.mrb[28].mxu0 %v893_v44  ;;  %v872_v52 = vmax.f32 %v800_v47, 0.0 }
 0x1ef   : > { %v795_v51 = vadd.f32 %v2183_v34, %v794_v37  ;;  %v870_v54 = vmax.f32 %v792_v49, 0.0 }
 0x1f0   : > { %v873_v53 = vmax.f32 %v803_v63, 0.0 }
 0x1f1   : > { %v871_v55 = vmax.f32 %v795_v51, 0.0 }
 0x1f2   : > { %v895_v56 = vpack.c.bf16 %v873_v53, %v872_v52 }
 0x1f3   : > { %v894_v57 = vpack.c.bf16 %v871_v55, %v870_v54  ;;  %v1706_v58 = vpop.f32.mrb[36].mxu1 }
 0x1f4   : > { %v816_v59 = vadd.f32 %v1706_v58, %v2183_v34  ;;  %v807_v60 = vpop.f32.mrb[37].mxu1 }
 0x1f5   : > { %v808_v61 = vadd.f32 %v2183_v34, %v807_v60  ;;  %v1707_v62 = vpop.f32.mrb[38].mxu1  ;;  %1748 = vmatprep.mubr.bf16.mxu0 %v894_v57 }
 0x1f6   : > { %v819_v0 = vadd.f32 %v1707_v62, %v2183_v34  ;;  %v810_v1 = vpop.f32.mrb[39].mxu1  ;;  %1749 = vmatmul.mubr.bf16.gmra.mrb[32].mxu0 %v895_v56  ;;  %v876_v3 = vmax.f32 %v816_v59, 0.0 }
 0x1f7   : > { %v811_v2 = vadd.f32 %v2183_v34, %v810_v1  ;;  %v874_v5 = vmax.f32 %v808_v61, 0.0 }
 0x1f8   : > { %v877_v4 = vmax.f32 %v819_v0, 0.0 }
 0x1f9   : > { %v875_v6 = vmax.f32 %v811_v2, 0.0 }
 0x1fa   : > { %v897_v7 = vpack.c.bf16 %v877_v4, %v876_v3 }
 0x1fb   : > { %v896_v8 = vpack.c.bf16 %v875_v6, %v874_v5  ;;  %v1710_v9 = vpop.f32.mrb[40].mxu1 }
 0x1fc   : > { %v832_v10 = vadd.f32 %v1710_v9, %v2183_v34  ;;  %v823_v11 = vpop.f32.mrb[41].mxu1 }
 0x1fd   : > { %v824_v12 = vadd.f32 %v2183_v34, %v823_v11  ;;  %v1711_v13 = vpop.f32.mrb[42].mxu1  ;;  %1752 = vmatprep.mubr.bf16.mxu0 %v896_v8 }
 0x1fe   : > { %v835_v14 = vadd.f32 %v1711_v13, %v2183_v34  ;;  %v826_v15 = vpop.f32.mrb[43].mxu1  ;;  %1753 = vmatmul.mubr.bf16.gmra.mrb[36].mxu0 %v897_v7  ;;  %v880_v17 = vmax.f32 %v832_v10, 0.0 }
 0x1ff   : > { %v827_v16 = vadd.f32 %v2183_v34, %v826_v15  ;;  %v878_v19 = vmax.f32 %v824_v12, 0.0 }
 0x200   : > { %v881_v18 = vmax.f32 %v835_v14, 0.0 }
 0x201   : > { %v879_v20 = vmax.f32 %v827_v16, 0.0 }
 0x202   : > { %v899_v21 = vpack.c.bf16 %v881_v18, %v880_v17 }
 0x203   : > { %v898_v22 = vpack.c.bf16 %v879_v20, %v878_v19  ;;  %v1714_v23 = vpop.f32.mrb[44].mxu1 }
 0x204   : > { %v848_v24 = vadd.f32 %v1714_v23, %v2183_v34  ;;  %v839_v25 = vpop.f32.mrb[45].mxu1 }
 0x205   : > { %v840_v26 = vadd.f32 %v2183_v34, %v839_v25  ;;  %v1715_v27 = vpop.f32.mrb[46].mxu1  ;;  %1756 = vmatprep.mubr.bf16.mxu0 %v898_v22 }
 0x206   : > { %v851_v28 = vadd.f32 %v1715_v27, %v2183_v34  ;;  %v842_v29 = vpop.f32.mrb[47].mxu1  ;;  %1757 = vmatmul.mubr.bf16.gmra.mrb[40].mxu0 %v899_v21  ;;  %v884_v31 = vmax.f32 %v848_v24, 0.0 }
 0x207   : > { %v843_v30 = vadd.f32 %v2183_v34, %v842_v29  ;;  %v882_v33 = vmax.f32 %v840_v26, 0.0 }
 0x208   : > { %v885_v32 = vmax.f32 %v851_v28, 0.0 }
 0x209   : > { %v883_v35 = vmax.f32 %v843_v30, 0.0 }
 0x20a   : > { %v901_v36 = vpack.c.bf16 %v885_v32, %v884_v31 }
 0x20b   : > { %v900_v38 = vpack.c.bf16 %v883_v35, %v882_v33 }
 0x20d   : > { %1760 = vmatprep.mubr.bf16.mxu0 %v900_v38 }
 0x20e   : > { %1761 = vmatmul.mubr.bf16.gmra.mrb[44].mxu0 %v901_v36 }
 0x2a9   : > { %v1734_v40 = vpop.f32.mrb[16].mxu0 }
 0x2aa   : > { %v1016_v41 = vadd.f32 %v1734_v40, %v2221_v39  ;;  %v1007_v34 = vpop.f32.mrb[17].mxu0 }
 0x2ab   : > { %v1008_v42 = vadd.f32 %v2221_v39, %v1007_v34  ;;  %v1735_v43 = vpop.f32.mrb[18].mxu0 }
 0x2ac   : > { %1137 = vst.msk [vmem:[%s2225_s30 + $0x10] sm:$0xff] %vm1134_vm1, %v1016_v41  ;;  %v1019_v44 = vadd.f32 %v1735_v43, %v2221_v39  ;;  %v1010_v45 = vpop.f32.mrb[19].mxu0 }
 0x2ad   : > { %1135 = vst.msk [vmem:[%s2225_s30] sm:$0xff] %vm1134_vm1, %v1008_v42  ;;  %v1011_v46 = vadd.f32 %v2221_v39, %v1010_v45 }
 0x2ae   : > { %1138 = vst.msk [vmem:[%s2225_s30 + $0x18] sm:$0xff] %vm1134_vm1, %v1019_v44 }
 0x2af   : > { %1136 = vst.msk [vmem:[%s2225_s30 + $0x8] sm:$0xff] %vm1134_vm1, %v1011_v46 }
 0x2b1   : > { %v1738_v47 = vpop.f32.mrb[20].mxu0 }
 0x2b2   : > { %v1032_v48 = vadd.f32 %v1738_v47, %v2221_v39  ;;  %v1023_v49 = vpop.f32.mrb[21].mxu0 }
 0x2b3   : > { %v1024_v50 = vadd.f32 %v2221_v39, %v1023_v49  ;;  %v1739_v63 = vpop.f32.mrb[22].mxu0 }
 0x2b4   : > { %1141 = vst.msk [vmem:[%s2225_s30 + $0x30] sm:$0xff] %vm1134_vm1, %v1032_v48  ;;  %v1035_v37 = vadd.f32 %v1739_v63, %v2221_v39  ;;  %v1026_v51 = vpop.f32.mrb[23].mxu0 }
 0x2b5   : > { %1139 = vst.msk [vmem:[%s2225_s30 + $0x20] sm:$0xff] %vm1134_vm1, %v1024_v50  ;;  %v1027_v52 = vadd.f32 %v2221_v39, %v1026_v51 }
 0x2b6   : > { %1142 = vst.msk [vmem:[%s2225_s30 + $0x38] sm:$0xff] %vm1134_vm1, %v1035_v37 }
 0x2b7   : > { %1140 = vst.msk [vmem:[%s2225_s30 + $0x28] sm:$0xff] %vm1134_vm1, %v1027_v52 }
 0x2b9   : > { %v1742_v53 = vpop.f32.mrb[24].mxu0 }
 0x2ba   : > { %v1048_v54 = vadd.f32 %v1742_v53, %v2221_v39  ;;  %v1039_v55 = vpop.f32.mrb[25].mxu0 }
 0x2bb   : > { %v1040_v56 = vadd.f32 %v2221_v39, %v1039_v55  ;;  %v1743_v57 = vpop.f32.mrb[26].mxu0 }
 0x2bc   : > { %1145 = vst.msk [vmem:[%s2225_s30 + $0x50] sm:$0xff] %vm1134_vm1, %v1048_v54  ;;  %v1051_v58 = vadd.f32 %v1743_v57, %v2221_v39  ;;  %v1042_v59 = vpop.f32.mrb[27].mxu0 }
 0x2bd   : > { %1143 = vst.msk [vmem:[%s2225_s30 + $0x40] sm:$0xff] %vm1134_vm1, %v1040_v56  ;;  %v1043_v60 = vadd.f32 %v2221_v39, %v1042_v59 }
 0x2be   : > { %1146 = vst.msk [vmem:[%s2225_s30 + $0x58] sm:$0xff] %vm1134_vm1, %v1051_v58 }
 0x2bf   : > { %1144 = vst.msk [vmem:[%s2225_s30 + $0x48] sm:$0xff] %vm1134_vm1, %v1043_v60 }
 0x2c1   : > { %v1746_v61 = vpop.f32.mrb[28].mxu0 }
 0x2c2   : > { %v1064_v62 = vadd.f32 %v1746_v61, %v2221_v39  ;;  %v1055_v0 = vpop.f32.mrb[29].mxu0 }
 0x2c3   : > { %v1056_v1 = vadd.f32 %v2221_v39, %v1055_v0  ;;  %v1747_v2 = vpop.f32.mrb[30].mxu0 }
 0x2c4   : > { %1149 = vst.msk [vmem:[%s2225_s30 + $0x70] sm:$0xff] %vm1134_vm1, %v1064_v62  ;;  %v1067_v3 = vadd.f32 %v1747_v2, %v2221_v39  ;;  %v1058_v4 = vpop.f32.mrb[31].mxu0 }
 0x2c5   : > { %1147 = vst.msk [vmem:[%s2225_s30 + $0x60] sm:$0xff] %vm1134_vm1, %v1056_v1  ;;  %v1059_v5 = vadd.f32 %v2221_v39, %v1058_v4 }
 0x2c6   : > { %1150 = vst.msk [vmem:[%s2225_s30 + $0x78] sm:$0xff] %vm1134_vm1, %v1067_v3 }
 0x2c7   : > { %1148 = vst.msk [vmem:[%s2225_s30 + $0x68] sm:$0xff] %vm1134_vm1, %v1059_v5 }
 0x2c9   : > { %v1750_v6 = vpop.f32.mrb[32].mxu0 }
 0x2ca   : > { %v1080_v7 = vadd.f32 %v1750_v6, %v2221_v39  ;;  %v1071_v8 = vpop.f32.mrb[33].mxu0 }
 0x2cb   : > { %v1072_v9 = vadd.f32 %v2221_v39, %v1071_v8  ;;  %v1751_v10 = vpop.f32.mrb[34].mxu0 }
 0x2cc   : > { %1153 = vst.msk [vmem:[%s2225_s30 + $0x90] sm:$0xff] %vm1134_vm1, %v1080_v7  ;;  %v1083_v11 = vadd.f32 %v1751_v10, %v2221_v39  ;;  %v1074_v12 = vpop.f32.mrb[35].mxu0 }
 0x2cd   : > { %1151 = vst.msk [vmem:[%s2225_s30 + $0x80] sm:$0xff] %vm1134_vm1, %v1072_v9  ;;  %v1075_v13 = vadd.f32 %v2221_v39, %v1074_v12 }
 0x2ce   : > { %1154 = vst.msk [vmem:[%s2225_s30 + $0x98] sm:$0xff] %vm1134_vm1, %v1083_v11 }
 0x2cf   : > { %1152 = vst.msk [vmem:[%s2225_s30 + $0x88] sm:$0xff] %vm1134_vm1, %v1075_v13 }
 0x2d1   : > { %v1754_v14 = vpop.f32.mrb[36].mxu0 }
 0x2d2   : > { %v1096_v15 = vadd.f32 %v1754_v14, %v2221_v39  ;;  %v1087_v16 = vpop.f32.mrb[37].mxu0 }
 0x2d3   : > { %v1088_v17 = vadd.f32 %v2221_v39, %v1087_v16  ;;  %v1755_v18 = vpop.f32.mrb[38].mxu0 }
 0x2d4   : > { %1157 = vst.msk [vmem:[%s2225_s30 + $0xb0] sm:$0xff] %vm1134_vm1, %v1096_v15  ;;  %v1099_v19 = vadd.f32 %v1755_v18, %v2221_v39  ;;  %v1090_v20 = vpop.f32.mrb[39].mxu0 }
 0x2d5   : > { %1155 = vst.msk [vmem:[%s2225_s30 + $0xa0] sm:$0xff] %vm1134_vm1, %v1088_v17  ;;  %v1091_v21 = vadd.f32 %v2221_v39, %v1090_v20 }
 0x2d6   : > { %1158 = vst.msk [vmem:[%s2225_s30 + $0xb8] sm:$0xff] %vm1134_vm1, %v1099_v19 }
 0x2d7   : > { %1156 = vst.msk [vmem:[%s2225_s30 + $0xa8] sm:$0xff] %vm1134_vm1, %v1091_v21 }
 0x2d9   : > { %v1758_v22 = vpop.f32.mrb[40].mxu0 }
 0x2da   : > { %v1112_v23 = vadd.f32 %v1758_v22, %v2221_v39  ;;  %v1103_v24 = vpop.f32.mrb[41].mxu0 }
 0x2db   : > { %v1104_v25 = vadd.f32 %v2221_v39, %v1103_v24  ;;  %v1759_v26 = vpop.f32.mrb[42].mxu0 }
 0x2dc   : > { %1161 = vst.msk [vmem:[%s2225_s30 + $0xd0] sm:$0xff] %vm1134_vm1, %v1112_v23  ;;  %v1115_v27 = vadd.f32 %v1759_v26, %v2221_v39  ;;  %v1106_v28 = vpop.f32.mrb[43].mxu0 }
 0x2dd   : > { %1159 = vst.msk [vmem:[%s2225_s30 + $0xc0] sm:$0xff] %vm1134_vm1, %v1104_v25  ;;  %v1107_v29 = vadd.f32 %v2221_v39, %v1106_v28 }
 0x2de   : > { %1162 = vst.msk [vmem:[%s2225_s30 + $0xd8] sm:$0xff] %vm1134_vm1, %v1115_v27 }
 0x2df   : > { %1160 = vst.msk [vmem:[%s2225_s30 + $0xc8] sm:$0xff] %vm1134_vm1, %v1107_v29 }
 0x2e1   : > { %v1762_v30 = vpop.f32.mrb[44].mxu0  ;;  %1173 = sbr.rel (!%p2024_p4) target bundleno = 800 (0x320), region = 52 }
 0x2e2   : > { %v1128_v31 = vadd.f32 %v1762_v30, %v2221_v39  ;;  %v1119_v32 = vpop.f32.mrb[45].mxu0 }
 0x2e3   : > { %v1120_v33 = vadd.f32 %v2221_v39, %v1119_v32  ;;  %v1763_v35 = vpop.f32.mrb[46].mxu0 }
 0x2e4   : > { %1165 = vst.msk [vmem:[%s2225_s30 + $0xf0] sm:$0xff] %vm1134_vm1, %v1128_v31  ;;  %v1131_v36 = vadd.f32 %v1763_v35, %v2221_v39  ;;  %v1122_v38 = vpop.f32.mrb[47].mxu0 }
 0x2e5   : > { %1163 = vst.msk [vmem:[%s2225_s30 + $0xe0] sm:$0xff] %vm1134_vm1, %v1120_v33  ;;  %v1123_v40 = vadd.f32 %v2221_v39, %v1122_v38 }
 0x2e6   : > { %1166 = vst.msk [vmem:[%s2225_s30 + $0xf8] sm:$0xff] %vm1134_vm1, %v1131_v36 }
 0x2e7   : > { %1164 = vst.msk [vmem:[%s2225_s30 + $0xe8] sm:$0xff] %vm1134_vm1, %v1123_v40 }
 0x2e8   : > { %s2478_s24 = smov (!%p1176_p8, %s1175_s24), 32 }
 0x2e9   : > { %s1551_s15 = sshll.u32 %s2478_s24, 7 }
 0x2ea   : > { %p1554_p9 = scmp.eq.s32.totalorder %s1551_s15, 0 }
 0x2eb   : > { %s2334_s16 = sshrl.u32 (!%p1554_p9), %s2478_s24, 5 }
 0x2ec   : > { %1184 = sbr.rel (%p1554_p9) target bundleno = 800 (0x320), region = 56  ;;  %p1555_p10 = scmp.le.s32.totalorder (!%p1554_p9), %s2334_s16, 0 }
 0x2f3   : > { %1462 = sbr.rel (%p1555_p10) target bundleno = 779 (0x30b), region = 132  ;;  %s2469_s27 = smov (!%p1555_p10), %s2328_s14 }
 0x2f4   : > { %s2470_s9 = smov (!%p1555_p10), %s2225_s30  ;;  %s2343_s12 = smov (!%p1555_p10), 0  }
 0x2f5   : > { %s2345_s17 = smov (!%p1555_p10), 0  }
 0x2fa LB: >> { %v1308_v39 = vld [vmem:[%s1933_s9] sm:$0xff]  ;;  %v1310_v41 = vld [vmem:[%s1933_s9 + $0x8] sm:$0xff]  ;;  %v1312_v34 = vld [vmem:[%s1933_s9 + $0x10] sm:$0xff]  ;;  %s1372_s18 = sadd.s32 1, %s1937_s12  ;;  %s1302_s17 = sadd.s32 1, %s1941_s17   ;;  %s1941_s17 = sphi %s2345_s17, %s1302_s17   ;;  %s1937_s12 = sphi %s2343_s12, %s2473_s12   ;;  %s1933_s9 = sphi %s2470_s9, %s2472_s9   ;;  %s1929_s27 = sphi %s2469_s27, %s2471_s27  }
 0x2fb   : >> { %1309 = vst [vmem:[%s1929_s27] sm:$0xff] %v1308_v39  ;;  %1311 = vst [vmem:[%s1929_s27 + $0x8] sm:$0xff] %v1310_v41  ;;  %v1314_v42 = vld [vmem:[%s1933_s9 + $0x18] sm:$0xff]  ;;  %v1316_v43 = vld [vmem:[%s1933_s9 + $0x20] sm:$0xff]  ;;  %p1373_p11 = scmp.ge.s32.totalorder %s1372_s18, %s2334_s16  ;;  %p1301_p12 = scmp.ge.s32.totalorder %s1302_s17, %s2334_s16 }
 0x2fc   : >> { %1313 = vst [vmem:[%s1929_s27 + $0x10] sm:$0xff] %v1312_v34  ;;  %v1318_v44 = vld [vmem:[%s1933_s9 + $0x28] sm:$0xff]  ;;  %1315 = vst [vmem:[%s1929_s27 + $0x18] sm:$0xff] %v1314_v42  ;;  %v1320_v45 = vld [vmem:[%s1933_s9 + $0x30] sm:$0xff] }
 0x2fd   : >> { %1317 = vst [vmem:[%s1929_s27 + $0x20] sm:$0xff] %v1316_v43  ;;  %1319 = vst [vmem:[%s1929_s27 + $0x28] sm:$0xff] %v1318_v44  ;;  %v1322_v46 = vld [vmem:[%s1933_s9 + $0x38] sm:$0xff]  ;;  %v1324_v47 = vld [vmem:[%s1933_s9 + $0x40] sm:$0xff]  ;;  %s2480_s18 = smov (%p1373_p11, %s1372_s18), 0 }
 0x2fe   : >> { %1321 = vst [vmem:[%s1929_s27 + $0x30] sm:$0xff] %v1320_v45  ;;  %1323 = vst [vmem:[%s1929_s27 + $0x38] sm:$0xff] %v1322_v46  ;;  %v1326_v48 = vld [vmem:[%s1933_s9 + $0x48] sm:$0xff]  ;;  %v1328_v49 = vld [vmem:[%s1933_s9 + $0x50] sm:$0xff]  ;;  %s1556_s19 = sshll.u32 %s2480_s18, 8  ;;  %s2473_s12 = smov %s2480_s18 }
 0x2ff   : >> { %1325 = vst [vmem:[%s1929_s27 + $0x40] sm:$0xff] %v1324_v47  ;;  %v1330_v50 = vld [vmem:[%s1933_s9 + $0x58] sm:$0xff]  ;;  %1327 = vst [vmem:[%s1929_s27 + $0x48] sm:$0xff] %v1326_v48  ;;  %v1332_v63 = vld [vmem:[%s1933_s9 + $0x60] sm:$0xff]  ;;  %s2401_s20 = scalar_lea.vmem %s2225_s30, %s1556_s19 [#allocation2]   ;;  %s1378_s21 = scalar_lea.vmem %s2328_s14, %s1556_s19  }
 0x300   : >> { %1329 = vst [vmem:[%s1929_s27 + $0x50] sm:$0xff] %v1328_v49  ;;  %1331 = vst [vmem:[%s1929_s27 + $0x58] sm:$0xff] %v1330_v50  ;;  %v1334_v37 = vld [vmem:[%s1933_s9 + $0x68] sm:$0xff]  ;;  %v1336_v51 = vld [vmem:[%s1933_s9 + $0x70] sm:$0xff] }
 0x301   : >> { %1333 = vst [vmem:[%s1929_s27 + $0x60] sm:$0xff] %v1332_v63  ;;  %1335 = vst [vmem:[%s1929_s27 + $0x68] sm:$0xff] %v1334_v37  ;;  %v1338_v52 = vld [vmem:[%s1933_s9 + $0x78] sm:$0xff]  ;;  %v1340_v53 = vld [vmem:[%s1933_s9 + $0x80] sm:$0xff] }
 0x302   : >> { %1337 = vst [vmem:[%s1929_s27 + $0x70] sm:$0xff] %v1336_v51  ;;  %v1342_v54 = vld [vmem:[%s1933_s9 + $0x88] sm:$0xff]  ;;  %1339 = vst [vmem:[%s1929_s27 + $0x78] sm:$0xff] %v1338_v52  ;;  %v1344_v55 = vld [vmem:[%s1933_s9 + $0x90] sm:$0xff] }
 0x303   : >> { %1341 = vst [vmem:[%s1929_s27 + $0x80] sm:$0xff] %v1340_v53  ;;  %1343 = vst [vmem:[%s1929_s27 + $0x88] sm:$0xff] %v1342_v54  ;;  %v1346_v56 = vld [vmem:[%s1933_s9 + $0x98] sm:$0xff]  ;;  %v1348_v57 = vld [vmem:[%s1933_s9 + $0xa0] sm:$0xff] }
 0x304   : >> { %1345 = vst [vmem:[%s1929_s27 + $0x90] sm:$0xff] %v1344_v55  ;;  %1347 = vst [vmem:[%s1929_s27 + $0x98] sm:$0xff] %v1346_v56  ;;  %v1350_v58 = vld [vmem:[%s1933_s9 + $0xa8] sm:$0xff]  ;;  %v1352_v59 = vld [vmem:[%s1933_s9 + $0xb0] sm:$0xff]  ;;  %1304 = sbr.rel (!%p1301_p12) target bundleno = 762 (0x2fa), region = 138 }
 0x305   : >> { %1349 = vst [vmem:[%s1929_s27 + $0xa0] sm:$0xff] %v1348_v57  ;;  %v1354_v60 = vld [vmem:[%s1933_s9 + $0xb8] sm:$0xff]  ;;  %1351 = vst [vmem:[%s1929_s27 + $0xa8] sm:$0xff] %v1350_v58  ;;  %v1356_v61 = vld [vmem:[%s1933_s9 + $0xc0] sm:$0xff] }
 0x306   : >> { %1353 = vst [vmem:[%s1929_s27 + $0xb0] sm:$0xff] %v1352_v59  ;;  %1355 = vst [vmem:[%s1929_s27 + $0xb8] sm:$0xff] %v1354_v60  ;;  %v1358_v62 = vld [vmem:[%s1933_s9 + $0xc8] sm:$0xff]  ;;  %v1360_v0 = vld [vmem:[%s1933_s9 + $0xd0] sm:$0xff] }
 0x307   : >> { %1357 = vst [vmem:[%s1929_s27 + $0xc0] sm:$0xff] %v1356_v61  ;;  %1359 = vst [vmem:[%s1929_s27 + $0xc8] sm:$0xff] %v1358_v62  ;;  %v1362_v1 = vld [vmem:[%s1933_s9 + $0xd8] sm:$0xff]  ;;  %v1364_v2 = vld [vmem:[%s1933_s9 + $0xe0] sm:$0xff] }
 0x308   : >> { %1361 = vst [vmem:[%s1929_s27 + $0xd0] sm:$0xff] %v1360_v0  ;;  %v1366_v3 = vld [vmem:[%s1933_s9 + $0xe8] sm:$0xff]  ;;  %1363 = vst [vmem:[%s1929_s27 + $0xd8] sm:$0xff] %v1362_v1  ;;  %v1368_v4 = vld [vmem:[%s1933_s9 + $0xf0] sm:$0xff] }
 0x309   : >> { %1365 = vst [vmem:[%s1929_s27 + $0xe0] sm:$0xff] %v1364_v2  ;;  %1367 = vst [vmem:[%s1929_s27 + $0xe8] sm:$0xff] %v1366_v3  ;;  %v1370_v5 = vld [vmem:[%s1933_s9 + $0xf8] sm:$0xff]  ;;  %s2472_s9 = smov %s2401_s20 }
 0x30a   : >> { %1369 = vst [vmem:[%s1929_s27 + $0xf0] sm:$0xff] %v1368_v4  ;;  %1371 = vst [vmem:[%s1929_s27 + $0xf8] sm:$0xff] %v1370_v5  ;;  %s2471_s27 = smov %s1378_s21 }
 0x30b PF: > { %s2442_s22 = sand.u32 31, %s2478_s24   ;;  %s1567_s23 = sshll.u32 %s2334_s16, 8 }
 0x30c   : > { %s1383_s26 = scalar_lea.vmem %s2225_s30, %s1567_s23 [#allocation2]   ;;  %s1385_s29 = scalar_lea.vmem %s2328_s14, %s1567_s23  }
 0x30d   : > { %p1561_p13 = scmp.le.s32.totalorder %s2442_s22, 0 }
 0x30e   : > { %s1943_s10 = smov (!%p1561_p13), %s1385_s29   ;;  %s1947_s11 = smov (!%p1561_p13), %s1383_s26  }
 0x30f   : > { %1476 = sbr.rel (%p1561_p13) target bundleno = 800 (0x320), region = 143  ;;  %s1951_s13 = smov (!%p1561_p13), 0  }
 0x310   : > { %s1955_s15 = smov (!%p1561_p13), 0  }
 0x316 LB: >> { %v1395_v6 = vld [vmem:[%s1949_s11] sm:$0xff]  ;;  %s1397_s24 = sadd.s32 1, %s1953_s13  ;;  %s1389_s15 = sadd.s32 1, %s1957_s15   ;;  %s1957_s15 = sphi %s1955_s15, %s1389_s15   ;;  %s1953_s13 = sphi %s1951_s13, %s1952_s13   ;;  %s1949_s11 = sphi %s1947_s11, %s1402_s11   ;;  %s1945_s10 = sphi %s1943_s10, %s1403_s10  }
 0x317   : >> { %1396 = vst [vmem:[%s1945_s10] sm:$0xff] %v1395_v6  ;;  %p1398_p0 = scmp.ge.s32.totalorder %s1397_s24, %s2442_s22  ;;  %p1388_p1 = scmp.ge.s32.totalorder %s1389_s15, %s2442_s22 }
 0x319   : >> { %s2482_s24 = smov (%p1398_p0, %s1397_s24), 0  ;;  %1391 = sbr.rel (!%p1388_p1) target bundleno = 790 (0x316), region = 149 }
 0x31a   : >> { %s1562_s30 = sshll.u32 %s2482_s24, 3  ;;  %s1952_s13 = smov %s2482_s24  }
 0x31b   : >> { %s1402_s11 = scalar_lea.vmem %s1383_s26, %s1562_s30 [#allocation2]   ;;  %s1403_s10 = scalar_lea.vmem %s1385_s29, %s1562_s30  }
 0x320 PF: > { %p14_p2 = scmp.ge.s32.totalorder %s2014_s28, 4   ;;  %s2474_s24 = smov %s1921_s25 }
 0x321   : > { %s2475_s25 = smov %s2022_s8  ;;  %s2476_s26 = smov %s2014_s28 }
 0x322   :  { %16 = sbr.rel (!%p14_p2) target bundleno = 2 (0x2), region = 160 }

</bundles_post_ra>
